<compile_context>
chip_gen: v6e
topology: v6e:2x2x1
jax: 0.10.0
libtpu: 0.0.40
codegen_flags: <defaults>
</compile_context>

<pallas_src>
import functools

import jax
import jax.numpy as jnp
import numpy as np
from jax.experimental import pallas as pl
from jax.experimental.pallas import tpu as pltpu

L = 128  # aligned lane-slot width for every intermediate conv row


# ----------------------------------------------------------------------------
# Fused kernel: whole encoder for one batch tile
# ----------------------------------------------------------------------------
def _vconv_encoder_kernel(x_ref, m1_ref, b1_ref, m2_ref, b2_ref, m3_ref, b3_ref,
                          wh1_ref, bh1_ref, wh2_ref, bh2_ref, out_ref,
                          a1_ref, a2_ref, a3_ref):
    f32 = jnp.float32
    bt = x_ref.shape[0]

    # -------- conv1 (1->8, k3 s2 p1): 14 output rows --------
    # x_ref lanes are (padded_h * 28 + w); one output row needs 3 consecutive padded
    # input rows -> a contiguous 84-lane slice, multiplied by a width-Toeplitz matrix.
    # Results go into 128-lane-aligned slots of a1 (slot 0 = conv2's zero padding row).
    a1_ref[:, 0:L] = jnp.zeros((bt, L), f32)
    m1 = m1_ref[...]                       # (84, 128); cols = ow*8 + cout (112 real)
    b1 = b1_ref[...]                       # (1, 128)
    for oh in range(14):
        sl = x_ref[:, 2 * oh * 28:(2 * oh + 3) * 28]            # (bt, 84)
        y = jnp.dot(sl, m1, preferred_element_type=f32) + b1
        a1_ref[:, (oh + 1) * L:(oh + 2) * L] = jnp.maximum(y, 0.0)

    # -------- conv2 (8->16, k3 s2 p1): 7 output rows, one fused-tap matmul each ----
    m2 = m2_ref[...]                       # (384, 128); rows = kh*128 + w*8 + cin
    b2 = b2_ref[...]                       # (1, 128)
    for oh in range(7):
        sl = a1_ref[:, 2 * oh * L:(2 * oh + 3) * L]             # (bt, 384), aligned
        y = jnp.dot(sl, m2, preferred_element_type=f32) + b2
        a2_ref[:, oh * L:(oh + 1) * L] = jnp.maximum(y, 0.0)

    # -------- conv3 (16->32, k3 s2 p0): 3 output rows, one fused-tap matmul each ----
    m3 = m3_ref[...]                       # (384, 128); rows = kh*128 + w*16 + cin
    b3 = b3_ref[...]                       # (1, 128)
    for oh in range(3):
        sl = a2_ref[:, 2 * oh * L:(2 * oh + 3) * L]             # (bt, 384), aligned
        y = jnp.dot(sl, m3, preferred_element_type=f32) + b3
        a3_ref[:, oh * L:(oh + 1) * L] = jnp.maximum(y, 0.0)

    # -------- fused heads: first linear of mean|logvar as ONE matmul --------
    h1 = jnp.dot(a3_ref[...], wh1_ref[...], preferred_element_type=f32) + bh1_ref[...]
    h1 = jnp.maximum(h1, 0.0)                                   # (bt, 128) = [hm | hv]

    # second head layer: block-diagonal (mean | logvar), padded to a 128-wide slab so
    # the HBM writeback is lane-dense (no masked partial stores).
    out = jnp.dot(h1, wh2_ref[...], preferred_element_type=f32) + bh2_ref[...]
    out_ref[...] = out.astype(out_ref.dtype)


# ----------------------------------------------------------------------------
# Host-side (one-time) folding of PyTorch-layout weights into matmul constants
# ----------------------------------------------------------------------------
def build_constants(params):
    w1 = np.asarray(params["c1_w"], np.float32)   # (8, 1, 3, 3)
    w2 = np.asarray(params["c2_w"], np.float32)   # (16, 8, 3, 3)
    w3 = np.asarray(params["c3_w"], np.float32)   # (32, 16, 3, 3)

    # conv1: rows = (kh, w_in) over 3 padded rows x 28 cols; cols = ow*8 + cout.
    m1 = np.zeros((3 * 28, L), np.float32)
    for kh in range(3):
        for ow in range(14):
            for kw in range(3):
                w = 2 * ow - 1 + kw
                if 0 <= w < 28:
                    m1[kh * 28 + w, ow * 8:(ow + 1) * 8] = w1[:, 0, kh, kw]
    b1 = np.zeros((1, L), np.float32)
    b1[0, :112] = np.tile(np.asarray(params["c1_b"], np.float32), 14)

    # conv2: the three kernel-row taps fused vertically; rows = kh*128 + w*8 + cin,
    # cols = ow*16 + cout.  Lanes 112..127 of each slot are zero padding.
    m2 = np.zeros((3 * L, L), np.float32)
    for kh in range(3):
        for ow in range(7):
            for kw in range(3):
                w = 2 * ow - 1 + kw
                if 0 <= w < 14:
                    m2[kh * L + w * 8:kh * L + (w + 1) * 8,
                       ow * 16:(ow + 1) * 16] = w2[:, :, kh, kw].T
    b2 = np.zeros((1, L), np.float32)
    b2[0, :112] = np.tile(np.asarray(params["c2_b"], np.float32), 7)

    # conv3 (no padding): rows = kh*128 + w*16 + cin, cols = ow*32 + cout.
    m3 = np.zeros((3 * L, L), np.float32)
    for kh in range(3):
        for ow in range(3):
            for kw in range(3):
                w = 2 * ow + kw
                m3[kh * L + w * 16:kh * L + (w + 1) * 16,
                   ow * 32:(ow + 1) * 32] = w3[:, :, kh, kw].T
    b3 = np.zeros((1, L), np.float32)
    b3[0, :96] = np.tile(np.asarray(params["c3_b"], np.float32), 3)

    # Fused heads.  Kernel flat-feature lane is oh*128 + ow*32 + c; PyTorch flatten is
    # (c, oh, ow), so the row permutation is folded into the weight.
    w1cat = np.concatenate([np.asarray(params["m1_w"], np.float32).T,
                            np.asarray(params["v1_w"], np.float32).T], axis=1)   # (288, 128)
    wh1 = np.zeros((3 * L, 128), np.float32)
    for oh in range(3):
        for ow in range(3):
            for c in range(32):
                wh1[oh * L + ow * 32 + c, :] = w1cat[c * 9 + oh * 3 + ow, :]
    bh1 = np.concatenate([np.asarray(params["m1_b"], np.float32),
                          np.asarray(params["v1_b"], np.float32)]).reshape(1, 128)

    d = np.asarray(params["m2_w"]).shape[0]
    wh2 = np.zeros((128, 128), np.float32)          # lane-dense padded output slab
    wh2[:64, :d] = np.asarray(params["m2_w"], np.float32).T
    wh2[64:, d:2 * d] = np.asarray(params["v2_w"], np.float32).T
    bh2 = np.zeros((1, 128), np.float32)
    bh2[0, :2 * d] = np.concatenate([np.asarray(params["m2_b"], np.float32),
                                     np.asarray(params["v2_b"], np.float32)])

    names = ["m1", "b1", "m2", "b2", "m3", "b3", "wh1", "bh1", "wh2", "bh2"]
    vals = [m1, b1, m2, b2, m3, b3, wh1, bh1, wh2, bh2]
    return {k: jnp.asarray(v) for k, v in zip(names, vals)}


# ----------------------------------------------------------------------------
# Public forward (mirrors VConvEncoder.forward)
# ----------------------------------------------------------------------------
@functools.partial(jax.jit, static_argnames=("d", "block_b"))
def vconv_encoder_forward(consts, x, *, d, block_b=128):
    """x: (B, 1, 28, 28) f32 NCHW -> (mean, log_var), each (B, d)."""
    assert block_b % 8 == 0
    B = x.shape[0]
    bt = block_b
    bp = ((B + bt - 1) // bt) * bt

    # Prep (once, cheap): drop singleton channel, zero-pad H by 1 (conv1 padding) and
    # batch to a tile multiple, flatten each image into one 840-wide lane-dense row.
    xs = jnp.pad(x[:, 0, :, :], ((0, bp - B), (1, 1), (0, 0))).reshape(bp, 30 * 28)

    out = pl.pallas_call(
        _vconv_encoder_kernel,
        out_shape=jax.ShapeDtypeStruct((bp, 128), jnp.float32),
        grid_spec=pltpu.PrefetchScalarGridSpec(
            num_scalar_prefetch=0,
            grid=(bp // bt,),
            in_specs=[
                pl.BlockSpec((bt, 840), lambda i: (i, 0)),        # x batch tile
                pl.BlockSpec((84, L), lambda i: (0, 0)),          # conv1 Toeplitz
                pl.BlockSpec((1, L), lambda i: (0, 0)),           # conv1 bias row
                pl.BlockSpec((3 * L, L), lambda i: (0, 0)),       # conv2 fused taps
                pl.BlockSpec((1, L), lambda i: (0, 0)),           # conv2 bias row
                pl.BlockSpec((3 * L, L), lambda i: (0, 0)),       # conv3 fused taps
                pl.BlockSpec((1, L), lambda i: (0, 0)),           # conv3 bias row
                pl.BlockSpec((3 * L, 128), lambda i: (0, 0)),     # fused head-1 weight
                pl.BlockSpec((1, 128), lambda i: (0, 0)),         # fused head-1 bias
                pl.BlockSpec((128, 128), lambda i: (0, 0)),       # block-diag head-2 weight
                pl.BlockSpec((1, 128), lambda i: (0, 0)),         # head-2 bias
            ],
            out_specs=pl.BlockSpec((bt, 128), lambda i: (i, 0)),
            scratch_shapes=[
                pltpu.VMEM((bt, 15 * L), jnp.float32),            # conv1 rows (+pad row)
                pltpu.VMEM((bt, 7 * L), jnp.float32),             # conv2 rows
                pltpu.VMEM((bt, 3 * L), jnp.float32),             # conv3 rows (flattened)
            ],
        ),
        compiler_params=pltpu.CompilerParams(
            dimension_semantics=("parallel",)),
    )(xs, consts["m1"], consts["b1"], consts["m2"], consts["b2"],
      consts["m3"], consts["b3"], consts["wh1"], consts["bh1"],
      consts["wh2"], consts["bh2"])

    return out[:B, :d], out[:B, d:2 * d]


# ----------------------------------------------------------------------------
# Deterministic parameter init (synthetic; shapes from the nn.Module __init__)
# ----------------------------------------------------------------------------
def init_params(encoded_space_dim, key):
    ks = jax.random.split(key, 14)

    def w(k, shape, fan_in):
        return (jax.random.normal(k, shape, jnp.float32) / jnp.sqrt(fan_in)).astype(jnp.float32)

    p = {}
    p["c1_w"] = w(ks[0], (8, 1, 3, 3), 1 * 9)
    p["c1_b"] = 0.01 * jax.random.normal(ks[1], (8,), jnp.float32)
    p["c2_w"] = w(ks[2], (16, 8, 3, 3), 8 * 9)
    p["c2_b"] = 0.01 * jax.random.normal(ks[3], (16,), jnp.float32)
    p["c3_w"] = w(ks[4], (32, 16, 3, 3), 16 * 9)
    p["c3_b"] = 0.01 * jax.random.normal(ks[5], (32,), jnp.float32)
    p["m1_w"] = w(ks[6], (64, 288), 288)
    p["m1_b"] = 0.01 * jax.random.normal(ks[7], (64,), jnp.float32)
    p["m2_w"] = w(ks[8], (encoded_space_dim, 64), 64)
    p["m2_b"] = 0.01 * jax.random.normal(ks[9], (encoded_space_dim,), jnp.float32)
    p["v1_w"] = w(ks[10], (64, 288), 288)
    p["v1_b"] = 0.01 * jax.random.normal(ks[11], (64,), jnp.float32)
    p["v2_w"] = w(ks[12], (encoded_space_dim, 64), 64)
    p["v2_b"] = 0.01 * jax.random.normal(ks[13], (encoded_space_dim,), jnp.float32)
    return p


# ----------------------------------------------------------------------------
# Pure-JAX reference (for a loose numerical self-check)
# ----------------------------------------------------------------------------
def reference_forward(params, x):
    def conv(h, w, b, stride, pad):
        y = jax.lax.conv_general_dilated(
            h, w, window_strides=(stride, stride),
            padding=[(pad, pad), (pad, pad)],
            dimension_numbers=("NCHW", "OIHW", "NCHW"))
        return jax.nn.relu(y + b[None, :, None, None])

    h = conv(x, params["c1_w"], params["c1_b"], 2, 1)
    h = conv(h, params["c2_w"], params["c2_b"], 2, 1)
    h = conv(h, params["c3_w"], params["c3_b"], 2, 0)
    flat = h.reshape(h.shape[0], -1)
    hm = jax.nn.relu(flat @ params["m1_w"].T + params["m1_b"])
    mean = hm @ params["m2_w"].T + params["m2_b"]
    hv = jax.nn.relu(flat @ params["v1_w"].T + params["v1_b"])
    log_var = hv @ params["v2_w"].T + params["v2_b"]
    return mean, log_var


if __name__ == "__main__":
    encoded_space_dim = 4
    batch = 2

    key = jax.random.PRNGKey(0)
    k_params, k_x = jax.random.split(key)
    params = init_params(encoded_space_dim, k_params)
    x = jax.random.normal(k_x, (batch, 1, 28, 28), jnp.float32)

    consts = build_constants(params)
    mean, log_var = vconv_encoder_forward(consts, x, d=encoded_space_dim, block_b=8)
    jax.block_until_ready((mean, log_var))

    assert mean.shape == (batch, encoded_space_dim)
    assert log_var.shape == (batch, encoded_space_dim)
    assert mean.dtype == jnp.float32 and log_var.dtype == jnp.float32

    with jax.default_matmul_precision("highest"):
        ref_mean, ref_log_var = reference_forward(params, x)
    np.testing.assert_allclose(np.asarray(mean), np.asarray(ref_mean), rtol=2e-2, atol=2e-2)
    np.testing.assert_allclose(np.asarray(log_var), np.asarray(ref_log_var), rtol=2e-2, atol=2e-2)

    print("KERNEL_OK")
</pallas_src>

<mosaic_0001>
module attributes {stable_mosaic.version = 11 : i64} {
  func.func @_vconv_encoder_kernel(%arg0: i32, %arg1: memref<8x840xf32, #tpu.memory_space<vmem>>, %arg2: memref<84x128xf32, #tpu.memory_space<vmem>>, %arg3: memref<1x128xf32, #tpu.memory_space<vmem>>, %arg4: memref<384x128xf32, #tpu.memory_space<vmem>>, %arg5: memref<1x128xf32, #tpu.memory_space<vmem>>, %arg6: memref<384x128xf32, #tpu.memory_space<vmem>>, %arg7: memref<1x128xf32, #tpu.memory_space<vmem>>, %arg8: memref<384x128xf32, #tpu.memory_space<vmem>>, %arg9: memref<1x128xf32, #tpu.memory_space<vmem>>, %arg10: memref<128x128xf32, #tpu.memory_space<vmem>>, %arg11: memref<1x128xf32, #tpu.memory_space<vmem>>, %arg12: memref<8x128xf32, #tpu.memory_space<vmem>>, %arg13: memref<8x1920xf32, #tpu.memory_space<vmem>>, %arg14: memref<8x896xf32, #tpu.memory_space<vmem>>, %arg15: memref<8x384xf32, #tpu.memory_space<vmem>>) attributes {dimension_semantics = [#tpu.dimension_semantics<parallel>], iteration_bounds = array<i64: 1>, scalar_prefetch = 0 : i64, scratch_operands = 3 : i64, tpu.core_type = #tpu.core_type<tc>, window_params = [{transform_indices = @transform_0, window_bounds = array<i64: 8, 840>}, {pipeline_mode = #tpu.pipeline_mode<synchronous>, transform_indices = @transform_1, window_bounds = array<i64: 84, 128>}, {pipeline_mode = #tpu.pipeline_mode<synchronous>, transform_indices = @transform_2, window_bounds = array<i64: 1, 128>}, {pipeline_mode = #tpu.pipeline_mode<synchronous>, transform_indices = @transform_3, window_bounds = array<i64: 384, 128>}, {pipeline_mode = #tpu.pipeline_mode<synchronous>, transform_indices = @transform_4, window_bounds = array<i64: 1, 128>}, {pipeline_mode = #tpu.pipeline_mode<synchronous>, transform_indices = @transform_5, window_bounds = array<i64: 384, 128>}, {pipeline_mode = #tpu.pipeline_mode<synchronous>, transform_indices = @transform_6, window_bounds = array<i64: 1, 128>}, {pipeline_mode = #tpu.pipeline_mode<synchronous>, transform_indices = @transform_7, window_bounds = array<i64: 384, 128>}, {pipeline_mode = #tpu.pipeline_mode<synchronous>, transform_indices = @transform_8, window_bounds = array<i64: 1, 128>}, {pipeline_mode = #tpu.pipeline_mode<synchronous>, transform_indices = @transform_9, window_bounds = array<i64: 128, 128>}, {pipeline_mode = #tpu.pipeline_mode<synchronous>, transform_indices = @transform_10, window_bounds = array<i64: 1, 128>}, {transform_indices = @transform_11, window_bounds = array<i64: 8, 128>}]} {
    %cst = arith.constant 0.000000e+00 : f32
    %0 = vector.broadcast %cst : f32 to vector<8x128xf32>
    %c0 = arith.constant 0 : index
    %c0_0 = arith.constant 0 : index
    %1 = vector.load %arg13[%c0, %c0_0] : memref<8x1920xf32, #tpu.memory_space<vmem>>, vector<8x128xf32>
    tpu.vector_store %arg13[%c0, %c0_0], %0 {strides = array<i32>} : memref<8x1920xf32, #tpu.memory_space<vmem>>, vector<8x128xf32>,
    %c0_1 = arith.constant 0 : index
    %c0_2 = arith.constant 0 : index
    %2 = vector.load %arg2[%c0_1, %c0_2] : memref<84x128xf32, #tpu.memory_space<vmem>>, vector<84x128xf32>
    %c0_3 = arith.constant 0 : index
    %c0_4 = arith.constant 0 : index
    %3 = vector.load %arg3[%c0_3, %c0_4] : memref<1x128xf32, #tpu.memory_space<vmem>>, vector<1x128xf32>
    %c0_5 = arith.constant 0 : index
    %c0_6 = arith.constant 0 : index
    %4 = vector.load %arg1[%c0_5, %c0_6] : memref<8x840xf32, #tpu.memory_space<vmem>>, vector<8x84xf32>
    %cst_7 = arith.constant dense<0.000000e+00> : vector<8x128xf32>
    %5 = tpu.matmul %4, %2, %cst_7 {dimension_numbers = #tpu.dot_dimension_numbers<[1], [0], [0], [1], [0, 0, 1, 1], [], []>} : vector<8x84xf32>, vector<84x128xf32>, vector<8x128xf32> -> vector<8x128xf32>
    %6 = vector.broadcast %3 : vector<1x128xf32> to vector<8x128xf32>
    %7 = arith.addf %5, %6 : vector<8x128xf32>
    %cst_8 = arith.constant 0.000000e+00 : f32
    %8 = vector.broadcast %cst_8 : f32 to vector<8x128xf32>
    %9 = arith.maximumf %7, %8 : vector<8x128xf32>
    %c0_9 = arith.constant 0 : index
    %c128 = arith.constant 128 : index
    %10 = vector.load %arg13[%c0_9, %c128] : memref<8x1920xf32, #tpu.memory_space<vmem>>, vector<8x128xf32>
    tpu.vector_store %arg13[%c0_9, %c128], %9 {strides = array<i32>} : memref<8x1920xf32, #tpu.memory_space<vmem>>, vector<8x128xf32>,
    %c0_10 = arith.constant 0 : index
    %c56 = arith.constant 56 : index
    %11 = vector.load %arg1[%c0_10, %c56] : memref<8x840xf32, #tpu.memory_space<vmem>>, vector<8x84xf32>
    %cst_11 = arith.constant dense<0.000000e+00> : vector<8x128xf32>
    %12 = tpu.matmul %11, %2, %cst_11 {dimension_numbers = #tpu.dot_dimension_numbers<[1], [0], [0], [1], [0, 0, 1, 1], [], []>} : vector<8x84xf32>, vector<84x128xf32>, vector<8x128xf32> -> vector<8x128xf32>
    %13 = vector.broadcast %3 : vector<1x128xf32> to vector<8x128xf32>
    %14 = arith.addf %12, %13 : vector<8x128xf32>
    %cst_12 = arith.constant 0.000000e+00 : f32
    %15 = vector.broadcast %cst_12 : f32 to vector<8x128xf32>
    %16 = arith.maximumf %14, %15 : vector<8x128xf32>
    %c0_13 = arith.constant 0 : index
    %c256 = arith.constant 256 : index
    %17 = vector.load %arg13[%c0_13, %c256] : memref<8x1920xf32, #tpu.memory_space<vmem>>, vector<8x128xf32>
    tpu.vector_store %arg13[%c0_13, %c256], %16 {strides = array<i32>} : memref<8x1920xf32, #tpu.memory_space<vmem>>, vector<8x128xf32>,
    %c0_14 = arith.constant 0 : index
    %c112 = arith.constant 112 : index
    %18 = vector.load %arg1[%c0_14, %c112] : memref<8x840xf32, #tpu.memory_space<vmem>>, vector<8x84xf32>
    %cst_15 = arith.constant dense<0.000000e+00> : vector<8x128xf32>
    %19 = tpu.matmul %18, %2, %cst_15 {dimension_numbers = #tpu.dot_dimension_numbers<[1], [0], [0], [1], [0, 0, 1, 1], [], []>} : vector<8x84xf32>, vector<84x128xf32>, vector<8x128xf32> -> vector<8x128xf32>
    %20 = vector.broadcast %3 : vector<1x128xf32> to vector<8x128xf32>
    %21 = arith.addf %19, %20 : vector<8x128xf32>
    %cst_16 = arith.constant 0.000000e+00 : f32
    %22 = vector.broadcast %cst_16 : f32 to vector<8x128xf32>
    %23 = arith.maximumf %21, %22 : vector<8x128xf32>
    %c0_17 = arith.constant 0 : index
    %c384 = arith.constant 384 : index
    %24 = vector.load %arg13[%c0_17, %c384] : memref<8x1920xf32, #tpu.memory_space<vmem>>, vector<8x128xf32>
    tpu.vector_store %arg13[%c0_17, %c384], %23 {strides = array<i32>} : memref<8x1920xf32, #tpu.memory_space<vmem>>, vector<8x128xf32>,
    %c0_18 = arith.constant 0 : index
    %c168 = arith.constant 168 : index
    %25 = vector.load %arg1[%c0_18, %c168] : memref<8x840xf32, #tpu.memory_space<vmem>>, vector<8x84xf32>
    %cst_19 = arith.constant dense<0.000000e+00> : vector<8x128xf32>
    %26 = tpu.matmul %25, %2, %cst_19 {dimension_numbers = #tpu.dot_dimension_numbers<[1], [0], [0], [1], [0, 0, 1, 1], [], []>} : vector<8x84xf32>, vector<84x128xf32>, vector<8x128xf32> -> vector<8x128xf32>
    %27 = vector.broadcast %3 : vector<1x128xf32> to vector<8x128xf32>
    %28 = arith.addf %26, %27 : vector<8x128xf32>
    %cst_20 = arith.constant 0.000000e+00 : f32
    %29 = vector.broadcast %cst_20 : f32 to vector<8x128xf32>
    %30 = arith.maximumf %28, %29 : vector<8x128xf32>
    %c0_21 = arith.constant 0 : index
    %c512 = arith.constant 512 : index
    %31 = vector.load %arg13[%c0_21, %c512] : memref<8x1920xf32, #tpu.memory_space<vmem>>, vector<8x128xf32>
    tpu.vector_store %arg13[%c0_21, %c512], %30 {strides = array<i32>} : memref<8x1920xf32, #tpu.memory_space<vmem>>, vector<8x128xf32>,
    %c0_22 = arith.constant 0 : index
    %c224 = arith.constant 224 : index
    %32 = vector.load %arg1[%c0_22, %c224] : memref<8x840xf32, #tpu.memory_space<vmem>>, vector<8x84xf32>
    %cst_23 = arith.constant dense<0.000000e+00> : vector<8x128xf32>
    %33 = tpu.matmul %32, %2, %cst_23 {dimension_numbers = #tpu.dot_dimension_numbers<[1], [0], [0], [1], [0, 0, 1, 1], [], []>} : vector<8x84xf32>, vector<84x128xf32>, vector<8x128xf32> -> vector<8x128xf32>
    %34 = vector.broadcast %3 : vector<1x128xf32> to vector<8x128xf32>
    %35 = arith.addf %33, %34 : vector<8x128xf32>
    %cst_24 = arith.constant 0.000000e+00 : f32
    %36 = vector.broadcast %cst_24 : f32 to vector<8x128xf32>
    %37 = arith.maximumf %35, %36 : vector<8x128xf32>
    %c0_25 = arith.constant 0 : index
    %c640 = arith.constant 640 : index
    %38 = vector.load %arg13[%c0_25, %c640] : memref<8x1920xf32, #tpu.memory_space<vmem>>, vector<8x128xf32>
    tpu.vector_store %arg13[%c0_25, %c640], %37 {strides = array<i32>} : memref<8x1920xf32, #tpu.memory_space<vmem>>, vector<8x128xf32>,
    %c0_26 = arith.constant 0 : index
    %c280 = arith.constant 280 : index
    %39 = vector.load %arg1[%c0_26, %c280] : memref<8x840xf32, #tpu.memory_space<vmem>>, vector<8x84xf32>
    %cst_27 = arith.constant dense<0.000000e+00> : vector<8x128xf32>
    %40 = tpu.matmul %39, %2, %cst_27 {dimension_numbers = #tpu.dot_dimension_numbers<[1], [0], [0], [1], [0, 0, 1, 1], [], []>} : vector<8x84xf32>, vector<84x128xf32>, vector<8x128xf32> -> vector<8x128xf32>
    %41 = vector.broadcast %3 : vector<1x128xf32> to vector<8x128xf32>
    %42 = arith.addf %40, %41 : vector<8x128xf32>
    %cst_28 = arith.constant 0.000000e+00 : f32
    %43 = vector.broadcast %cst_28 : f32 to vector<8x128xf32>
    %44 = arith.maximumf %42, %43 : vector<8x128xf32>
    %c0_29 = arith.constant 0 : index
    %c768 = arith.constant 768 : index
    %45 = vector.load %arg13[%c0_29, %c768] : memref<8x1920xf32, #tpu.memory_space<vmem>>, vector<8x128xf32>
    tpu.vector_store %arg13[%c0_29, %c768], %44 {strides = array<i32>} : memref<8x1920xf32, #tpu.memory_space<vmem>>, vector<8x128xf32>,
    %c0_30 = arith.constant 0 : index
    %c336 = arith.constant 336 : index
    %46 = vector.load %arg1[%c0_30, %c336] : memref<8x840xf32, #tpu.memory_space<vmem>>, vector<8x84xf32>
    %cst_31 = arith.constant dense<0.000000e+00> : vector<8x128xf32>
    %47 = tpu.matmul %46, %2, %cst_31 {dimension_numbers = #tpu.dot_dimension_numbers<[1], [0], [0], [1], [0, 0, 1, 1], [], []>} : vector<8x84xf32>, vector<84x128xf32>, vector<8x128xf32> -> vector<8x128xf32>
    %48 = vector.broadcast %3 : vector<1x128xf32> to vector<8x128xf32>
    %49 = arith.addf %47, %48 : vector<8x128xf32>
    %cst_32 = arith.constant 0.000000e+00 : f32
    %50 = vector.broadcast %cst_32 : f32 to vector<8x128xf32>
    %51 = arith.maximumf %49, %50 : vector<8x128xf32>
    %c0_33 = arith.constant 0 : index
    %c896 = arith.constant 896 : index
    %52 = vector.load %arg13[%c0_33, %c896] : memref<8x1920xf32, #tpu.memory_space<vmem>>, vector<8x128xf32>
    tpu.vector_store %arg13[%c0_33, %c896], %51 {strides = array<i32>} : memref<8x1920xf32, #tpu.memory_space<vmem>>, vector<8x128xf32>,
    %c0_34 = arith.constant 0 : index
    %c392 = arith.constant 392 : index
    %53 = vector.load %arg1[%c0_34, %c392] : memref<8x840xf32, #tpu.memory_space<vmem>>, vector<8x84xf32>
    %cst_35 = arith.constant dense<0.000000e+00> : vector<8x128xf32>
    %54 = tpu.matmul %53, %2, %cst_35 {dimension_numbers = #tpu.dot_dimension_numbers<[1], [0], [0], [1], [0, 0, 1, 1], [], []>} : vector<8x84xf32>, vector<84x128xf32>, vector<8x128xf32> -> vector<8x128xf32>
    %55 = vector.broadcast %3 : vector<1x128xf32> to vector<8x128xf32>
    %56 = arith.addf %54, %55 : vector<8x128xf32>
    %cst_36 = arith.constant 0.000000e+00 : f32
    %57 = vector.broadcast %cst_36 : f32 to vector<8x128xf32>
    %58 = arith.maximumf %56, %57 : vector<8x128xf32>
    %c0_37 = arith.constant 0 : index
    %c1024 = arith.constant 1024 : index
    %59 = vector.load %arg13[%c0_37, %c1024] : memref<8x1920xf32, #tpu.memory_space<vmem>>, vector<8x128xf32>
    tpu.vector_store %arg13[%c0_37, %c1024], %58 {strides = array<i32>} : memref<8x1920xf32, #tpu.memory_space<vmem>>, vector<8x128xf32>,
    %c0_38 = arith.constant 0 : index
    %c448 = arith.constant 448 : index
    %60 = vector.load %arg1[%c0_38, %c448] : memref<8x840xf32, #tpu.memory_space<vmem>>, vector<8x84xf32>
    %cst_39 = arith.constant dense<0.000000e+00> : vector<8x128xf32>
    %61 = tpu.matmul %60, %2, %cst_39 {dimension_numbers = #tpu.dot_dimension_numbers<[1], [0], [0], [1], [0, 0, 1, 1], [], []>} : vector<8x84xf32>, vector<84x128xf32>, vector<8x128xf32> -> vector<8x128xf32>
    %62 = vector.broadcast %3 : vector<1x128xf32> to vector<8x128xf32>
    %63 = arith.addf %61, %62 : vector<8x128xf32>
    %cst_40 = arith.constant 0.000000e+00 : f32
    %64 = vector.broadcast %cst_40 : f32 to vector<8x128xf32>
    %65 = arith.maximumf %63, %64 : vector<8x128xf32>
    %c0_41 = arith.constant 0 : index
    %c1152 = arith.constant 1152 : index
    %66 = vector.load %arg13[%c0_41, %c1152] : memref<8x1920xf32, #tpu.memory_space<vmem>>, vector<8x128xf32>
    tpu.vector_store %arg13[%c0_41, %c1152], %65 {strides = array<i32>} : memref<8x1920xf32, #tpu.memory_space<vmem>>, vector<8x128xf32>,
    %c0_42 = arith.constant 0 : index
    %c504 = arith.constant 504 : index
    %67 = vector.load %arg1[%c0_42, %c504] : memref<8x840xf32, #tpu.memory_space<vmem>>, vector<8x84xf32>
    %cst_43 = arith.constant dense<0.000000e+00> : vector<8x128xf32>
    %68 = tpu.matmul %67, %2, %cst_43 {dimension_numbers = #tpu.dot_dimension_numbers<[1], [0], [0], [1], [0, 0, 1, 1], [], []>} : vector<8x84xf32>, vector<84x128xf32>, vector<8x128xf32> -> vector<8x128xf32>
    %69 = vector.broadcast %3 : vector<1x128xf32> to vector<8x128xf32>
    %70 = arith.addf %68, %69 : vector<8x128xf32>
    %cst_44 = arith.constant 0.000000e+00 : f32
    %71 = vector.broadcast %cst_44 : f32 to vector<8x128xf32>
    %72 = arith.maximumf %70, %71 : vector<8x128xf32>
    %c0_45 = arith.constant 0 : index
    %c1280 = arith.constant 1280 : index
    %73 = vector.load %arg13[%c0_45, %c1280] : memref<8x1920xf32, #tpu.memory_space<vmem>>, vector<8x128xf32>
    tpu.vector_store %arg13[%c0_45, %c1280], %72 {strides = array<i32>} : memref<8x1920xf32, #tpu.memory_space<vmem>>, vector<8x128xf32>,
    %c0_46 = arith.constant 0 : index
    %c560 = arith.constant 560 : index
    %74 = vector.load %arg1[%c0_46, %c560] : memref<8x840xf32, #tpu.memory_space<vmem>>, vector<8x84xf32>
    %cst_47 = arith.constant dense<0.000000e+00> : vector<8x128xf32>
    %75 = tpu.matmul %74, %2, %cst_47 {dimension_numbers = #tpu.dot_dimension_numbers<[1], [0], [0], [1], [0, 0, 1, 1], [], []>} : vector<8x84xf32>, vector<84x128xf32>, vector<8x128xf32> -> vector<8x128xf32>
    %76 = vector.broadcast %3 : vector<1x128xf32> to vector<8x128xf32>
    %77 = arith.addf %75, %76 : vector<8x128xf32>
    %cst_48 = arith.constant 0.000000e+00 : f32
    %78 = vector.broadcast %cst_48 : f32 to vector<8x128xf32>
    %79 = arith.maximumf %77, %78 : vector<8x128xf32>
    %c0_49 = arith.constant 0 : index
    %c1408 = arith.constant 1408 : index
    %80 = vector.load %arg13[%c0_49, %c1408] : memref<8x1920xf32, #tpu.memory_space<vmem>>, vector<8x128xf32>
    tpu.vector_store %arg13[%c0_49, %c1408], %79 {strides = array<i32>} : memref<8x1920xf32, #tpu.memory_space<vmem>>, vector<8x128xf32>,
    %c0_50 = arith.constant 0 : index
    %c616 = arith.constant 616 : index
    %81 = vector.load %arg1[%c0_50, %c616] : memref<8x840xf32, #tpu.memory_space<vmem>>, vector<8x84xf32>
    %cst_51 = arith.constant dense<0.000000e+00> : vector<8x128xf32>
    %82 = tpu.matmul %81, %2, %cst_51 {dimension_numbers = #tpu.dot_dimension_numbers<[1], [0], [0], [1], [0, 0, 1, 1], [], []>} : vector<8x84xf32>, vector<84x128xf32>, vector<8x128xf32> -> vector<8x128xf32>
    %83 = vector.broadcast %3 : vector<1x128xf32> to vector<8x128xf32>
    %84 = arith.addf %82, %83 : vector<8x128xf32>
    %cst_52 = arith.constant 0.000000e+00 : f32
    %85 = vector.broadcast %cst_52 : f32 to vector<8x128xf32>
    %86 = arith.maximumf %84, %85 : vector<8x128xf32>
    %c0_53 = arith.constant 0 : index
    %c1536 = arith.constant 1536 : index
    %87 = vector.load %arg13[%c0_53, %c1536] : memref<8x1920xf32, #tpu.memory_space<vmem>>, vector<8x128xf32>
    tpu.vector_store %arg13[%c0_53, %c1536], %86 {strides = array<i32>} : memref<8x1920xf32, #tpu.memory_space<vmem>>, vector<8x128xf32>,
    %c0_54 = arith.constant 0 : index
    %c672 = arith.constant 672 : index
    %88 = vector.load %arg1[%c0_54, %c672] : memref<8x840xf32, #tpu.memory_space<vmem>>, vector<8x84xf32>
    %cst_55 = arith.constant dense<0.000000e+00> : vector<8x128xf32>
    %89 = tpu.matmul %88, %2, %cst_55 {dimension_numbers = #tpu.dot_dimension_numbers<[1], [0], [0], [1], [0, 0, 1, 1], [], []>} : vector<8x84xf32>, vector<84x128xf32>, vector<8x128xf32> -> vector<8x128xf32>
    %90 = vector.broadcast %3 : vector<1x128xf32> to vector<8x128xf32>
    %91 = arith.addf %89, %90 : vector<8x128xf32>
    %cst_56 = arith.constant 0.000000e+00 : f32
    %92 = vector.broadcast %cst_56 : f32 to vector<8x128xf32>
    %93 = arith.maximumf %91, %92 : vector<8x128xf32>
    %c0_57 = arith.constant 0 : index
    %c1664 = arith.constant 1664 : index
    %94 = vector.load %arg13[%c0_57, %c1664] : memref<8x1920xf32, #tpu.memory_space<vmem>>, vector<8x128xf32>
    tpu.vector_store %arg13[%c0_57, %c1664], %93 {strides = array<i32>} : memref<8x1920xf32, #tpu.memory_space<vmem>>, vector<8x128xf32>,
    %c0_58 = arith.constant 0 : index
    %c728 = arith.constant 728 : index
    %95 = vector.load %arg1[%c0_58, %c728] : memref<8x840xf32, #tpu.memory_space<vmem>>, vector<8x84xf32>
    %cst_59 = arith.constant dense<0.000000e+00> : vector<8x128xf32>
    %96 = tpu.matmul %95, %2, %cst_59 {dimension_numbers = #tpu.dot_dimension_numbers<[1], [0], [0], [1], [0, 0, 1, 1], [], []>} : vector<8x84xf32>, vector<84x128xf32>, vector<8x128xf32> -> vector<8x128xf32>
    %97 = vector.broadcast %3 : vector<1x128xf32> to vector<8x128xf32>
    %98 = arith.addf %96, %97 : vector<8x128xf32>
    %cst_60 = arith.constant 0.000000e+00 : f32
    %99 = vector.broadcast %cst_60 : f32 to vector<8x128xf32>
    %100 = arith.maximumf %98, %99 : vector<8x128xf32>
    %c0_61 = arith.constant 0 : index
    %c1792 = arith.constant 1792 : index
    %101 = vector.load %arg13[%c0_61, %c1792] : memref<8x1920xf32, #tpu.memory_space<vmem>>, vector<8x128xf32>
    tpu.vector_store %arg13[%c0_61, %c1792], %100 {strides = array<i32>} : memref<8x1920xf32, #tpu.memory_space<vmem>>, vector<8x128xf32>,
    %c0_62 = arith.constant 0 : index
    %c0_63 = arith.constant 0 : index
    %102 = vector.load %arg4[%c0_62, %c0_63] : memref<384x128xf32, #tpu.memory_space<vmem>>, vector<384x128xf32>
    %c0_64 = arith.constant 0 : index
    %c0_65 = arith.constant 0 : index
    %103 = vector.load %arg5[%c0_64, %c0_65] : memref<1x128xf32, #tpu.memory_space<vmem>>, vector<1x128xf32>
    %c0_66 = arith.constant 0 : index
    %c0_67 = arith.constant 0 : index
    %104 = vector.load %arg13[%c0_66, %c0_67] : memref<8x1920xf32, #tpu.memory_space<vmem>>, vector<8x384xf32>
    %cst_68 = arith.constant dense<0.000000e+00> : vector<8x128xf32>
    %105 = tpu.matmul %104, %102, %cst_68 {dimension_numbers = #tpu.dot_dimension_numbers<[1], [0], [0], [1], [0, 0, 1, 1], [], []>} : vector<8x384xf32>, vector<384x128xf32>, vector<8x128xf32> -> vector<8x128xf32>
    %106 = vector.broadcast %103 : vector<1x128xf32> to vector<8x128xf32>
    %107 = arith.addf %105, %106 : vector<8x128xf32>
    %cst_69 = arith.constant 0.000000e+00 : f32
    %108 = vector.broadcast %cst_69 : f32 to vector<8x128xf32>
    %109 = arith.maximumf %107, %108 : vector<8x128xf32>
    %c0_70 = arith.constant 0 : index
    %c0_71 = arith.constant 0 : index
    %110 = vector.load %arg14[%c0_70, %c0_71] : memref<8x896xf32, #tpu.memory_space<vmem>>, vector<8x128xf32>
    tpu.vector_store %arg14[%c0_70, %c0_71], %109 {strides = array<i32>} : memref<8x896xf32, #tpu.memory_space<vmem>>, vector<8x128xf32>,
    %c0_72 = arith.constant 0 : index
    %c256_73 = arith.constant 256 : index
    %111 = vector.load %arg13[%c0_72, %c256_73] : memref<8x1920xf32, #tpu.memory_space<vmem>>, vector<8x384xf32>
    %cst_74 = arith.constant dense<0.000000e+00> : vector<8x128xf32>
    %112 = tpu.matmul %111, %102, %cst_74 {dimension_numbers = #tpu.dot_dimension_numbers<[1], [0], [0], [1], [0, 0, 1, 1], [], []>} : vector<8x384xf32>, vector<384x128xf32>, vector<8x128xf32> -> vector<8x128xf32>
    %113 = vector.broadcast %103 : vector<1x128xf32> to vector<8x128xf32>
    %114 = arith.addf %112, %113 : vector<8x128xf32>
    %cst_75 = arith.constant 0.000000e+00 : f32
    %115 = vector.broadcast %cst_75 : f32 to vector<8x128xf32>
    %116 = arith.maximumf %114, %115 : vector<8x128xf32>
    %c0_76 = arith.constant 0 : index
    %c128_77 = arith.constant 128 : index
    %117 = vector.load %arg14[%c0_76, %c128_77] : memref<8x896xf32, #tpu.memory_space<vmem>>, vector<8x128xf32>
    tpu.vector_store %arg14[%c0_76, %c128_77], %116 {strides = array<i32>} : memref<8x896xf32, #tpu.memory_space<vmem>>, vector<8x128xf32>,
    %c0_78 = arith.constant 0 : index
    %c512_79 = arith.constant 512 : index
    %118 = vector.load %arg13[%c0_78, %c512_79] : memref<8x1920xf32, #tpu.memory_space<vmem>>, vector<8x384xf32>
    %cst_80 = arith.constant dense<0.000000e+00> : vector<8x128xf32>
    %119 = tpu.matmul %118, %102, %cst_80 {dimension_numbers = #tpu.dot_dimension_numbers<[1], [0], [0], [1], [0, 0, 1, 1], [], []>} : vector<8x384xf32>, vector<384x128xf32>, vector<8x128xf32> -> vector<8x128xf32>
    %120 = vector.broadcast %103 : vector<1x128xf32> to vector<8x128xf32>
    %121 = arith.addf %119, %120 : vector<8x128xf32>
    %cst_81 = arith.constant 0.000000e+00 : f32
    %122 = vector.broadcast %cst_81 : f32 to vector<8x128xf32>
    %123 = arith.maximumf %121, %122 : vector<8x128xf32>
    %c0_82 = arith.constant 0 : index
    %c256_83 = arith.constant 256 : index
    %124 = vector.load %arg14[%c0_82, %c256_83] : memref<8x896xf32, #tpu.memory_space<vmem>>, vector<8x128xf32>
    tpu.vector_store %arg14[%c0_82, %c256_83], %123 {strides = array<i32>} : memref<8x896xf32, #tpu.memory_space<vmem>>, vector<8x128xf32>,
    %c0_84 = arith.constant 0 : index
    %c768_85 = arith.constant 768 : index
    %125 = vector.load %arg13[%c0_84, %c768_85] : memref<8x1920xf32, #tpu.memory_space<vmem>>, vector<8x384xf32>
    %cst_86 = arith.constant dense<0.000000e+00> : vector<8x128xf32>
    %126 = tpu.matmul %125, %102, %cst_86 {dimension_numbers = #tpu.dot_dimension_numbers<[1], [0], [0], [1], [0, 0, 1, 1], [], []>} : vector<8x384xf32>, vector<384x128xf32>, vector<8x128xf32> -> vector<8x128xf32>
    %127 = vector.broadcast %103 : vector<1x128xf32> to vector<8x128xf32>
    %128 = arith.addf %126, %127 : vector<8x128xf32>
    %cst_87 = arith.constant 0.000000e+00 : f32
    %129 = vector.broadcast %cst_87 : f32 to vector<8x128xf32>
    %130 = arith.maximumf %128, %129 : vector<8x128xf32>
    %c0_88 = arith.constant 0 : index
    %c384_89 = arith.constant 384 : index
    %131 = vector.load %arg14[%c0_88, %c384_89] : memref<8x896xf32, #tpu.memory_space<vmem>>, vector<8x128xf32>
    tpu.vector_store %arg14[%c0_88, %c384_89], %130 {strides = array<i32>} : memref<8x896xf32, #tpu.memory_space<vmem>>, vector<8x128xf32>,
    %c0_90 = arith.constant 0 : index
    %c1024_91 = arith.constant 1024 : index
    %132 = vector.load %arg13[%c0_90, %c1024_91] : memref<8x1920xf32, #tpu.memory_space<vmem>>, vector<8x384xf32>
    %cst_92 = arith.constant dense<0.000000e+00> : vector<8x128xf32>
    %133 = tpu.matmul %132, %102, %cst_92 {dimension_numbers = #tpu.dot_dimension_numbers<[1], [0], [0], [1], [0, 0, 1, 1], [], []>} : vector<8x384xf32>, vector<384x128xf32>, vector<8x128xf32> -> vector<8x128xf32>
    %134 = vector.broadcast %103 : vector<1x128xf32> to vector<8x128xf32>
    %135 = arith.addf %133, %134 : vector<8x128xf32>
    %cst_93 = arith.constant 0.000000e+00 : f32
    %136 = vector.broadcast %cst_93 : f32 to vector<8x128xf32>
    %137 = arith.maximumf %135, %136 : vector<8x128xf32>
    %c0_94 = arith.constant 0 : index
    %c512_95 = arith.constant 512 : index
    %138 = vector.load %arg14[%c0_94, %c512_95] : memref<8x896xf32, #tpu.memory_space<vmem>>, vector<8x128xf32>
    tpu.vector_store %arg14[%c0_94, %c512_95], %137 {strides = array<i32>} : memref<8x896xf32, #tpu.memory_space<vmem>>, vector<8x128xf32>,
    %c0_96 = arith.constant 0 : index
    %c1280_97 = arith.constant 1280 : index
    %139 = vector.load %arg13[%c0_96, %c1280_97] : memref<8x1920xf32, #tpu.memory_space<vmem>>, vector<8x384xf32>
    %cst_98 = arith.constant dense<0.000000e+00> : vector<8x128xf32>
    %140 = tpu.matmul %139, %102, %cst_98 {dimension_numbers = #tpu.dot_dimension_numbers<[1], [0], [0], [1], [0, 0, 1, 1], [], []>} : vector<8x384xf32>, vector<384x128xf32>, vector<8x128xf32> -> vector<8x128xf32>
    %141 = vector.broadcast %103 : vector<1x128xf32> to vector<8x128xf32>
    %142 = arith.addf %140, %141 : vector<8x128xf32>
    %cst_99 = arith.constant 0.000000e+00 : f32
    %143 = vector.broadcast %cst_99 : f32 to vector<8x128xf32>
    %144 = arith.maximumf %142, %143 : vector<8x128xf32>
    %c0_100 = arith.constant 0 : index
    %c640_101 = arith.constant 640 : index
    %145 = vector.load %arg14[%c0_100, %c640_101] : memref<8x896xf32, #tpu.memory_space<vmem>>, vector<8x128xf32>
    tpu.vector_store %arg14[%c0_100, %c640_101], %144 {strides = array<i32>} : memref<8x896xf32, #tpu.memory_space<vmem>>, vector<8x128xf32>,
    %c0_102 = arith.constant 0 : index
    %c1536_103 = arith.constant 1536 : index
    %146 = vector.load %arg13[%c0_102, %c1536_103] : memref<8x1920xf32, #tpu.memory_space<vmem>>, vector<8x384xf32>
    %cst_104 = arith.constant dense<0.000000e+00> : vector<8x128xf32>
    %147 = tpu.matmul %146, %102, %cst_104 {dimension_numbers = #tpu.dot_dimension_numbers<[1], [0], [0], [1], [0, 0, 1, 1], [], []>} : vector<8x384xf32>, vector<384x128xf32>, vector<8x128xf32> -> vector<8x128xf32>
    %148 = vector.broadcast %103 : vector<1x128xf32> to vector<8x128xf32>
    %149 = arith.addf %147, %148 : vector<8x128xf32>
    %cst_105 = arith.constant 0.000000e+00 : f32
    %150 = vector.broadcast %cst_105 : f32 to vector<8x128xf32>
    %151 = arith.maximumf %149, %150 : vector<8x128xf32>
    %c0_106 = arith.constant 0 : index
    %c768_107 = arith.constant 768 : index
    %152 = vector.load %arg14[%c0_106, %c768_107] : memref<8x896xf32, #tpu.memory_space<vmem>>, vector<8x128xf32>
    tpu.vector_store %arg14[%c0_106, %c768_107], %151 {strides = array<i32>} : memref<8x896xf32, #tpu.memory_space<vmem>>, vector<8x128xf32>,
    %c0_108 = arith.constant 0 : index
    %c0_109 = arith.constant 0 : index
    %153 = vector.load %arg6[%c0_108, %c0_109] : memref<384x128xf32, #tpu.memory_space<vmem>>, vector<384x128xf32>
    %c0_110 = arith.constant 0 : index
    %c0_111 = arith.constant 0 : index
    %154 = vector.load %arg7[%c0_110, %c0_111] : memref<1x128xf32, #tpu.memory_space<vmem>>, vector<1x128xf32>
    %c0_112 = arith.constant 0 : index
    %c0_113 = arith.constant 0 : index
    %155 = vector.load %arg14[%c0_112, %c0_113] : memref<8x896xf32, #tpu.memory_space<vmem>>, vector<8x384xf32>
    %cst_114 = arith.constant dense<0.000000e+00> : vector<8x128xf32>
    %156 = tpu.matmul %155, %153, %cst_114 {dimension_numbers = #tpu.dot_dimension_numbers<[1], [0], [0], [1], [0, 0, 1, 1], [], []>} : vector<8x384xf32>, vector<384x128xf32>, vector<8x128xf32> -> vector<8x128xf32>
    %157 = vector.broadcast %154 : vector<1x128xf32> to vector<8x128xf32>
    %158 = arith.addf %156, %157 : vector<8x128xf32>
    %cst_115 = arith.constant 0.000000e+00 : f32
    %159 = vector.broadcast %cst_115 : f32 to vector<8x128xf32>
    %160 = arith.maximumf %158, %159 : vector<8x128xf32>
    %c0_116 = arith.constant 0 : index
    %c0_117 = arith.constant 0 : index
    %161 = vector.load %arg15[%c0_116, %c0_117] : memref<8x384xf32, #tpu.memory_space<vmem>>, vector<8x128xf32>
    tpu.vector_store %arg15[%c0_116, %c0_117], %160 {strides = array<i32>} : memref<8x384xf32, #tpu.memory_space<vmem>>, vector<8x128xf32>,
    %c0_118 = arith.constant 0 : index
    %c256_119 = arith.constant 256 : index
    %162 = vector.load %arg14[%c0_118, %c256_119] : memref<8x896xf32, #tpu.memory_space<vmem>>, vector<8x384xf32>
    %cst_120 = arith.constant dense<0.000000e+00> : vector<8x128xf32>
    %163 = tpu.matmul %162, %153, %cst_120 {dimension_numbers = #tpu.dot_dimension_numbers<[1], [0], [0], [1], [0, 0, 1, 1], [], []>} : vector<8x384xf32>, vector<384x128xf32>, vector<8x128xf32> -> vector<8x128xf32>
    %164 = vector.broadcast %154 : vector<1x128xf32> to vector<8x128xf32>
    %165 = arith.addf %163, %164 : vector<8x128xf32>
    %cst_121 = arith.constant 0.000000e+00 : f32
    %166 = vector.broadcast %cst_121 : f32 to vector<8x128xf32>
    %167 = arith.maximumf %165, %166 : vector<8x128xf32>
    %c0_122 = arith.constant 0 : index
    %c128_123 = arith.constant 128 : index
    %168 = vector.load %arg15[%c0_122, %c128_123] : memref<8x384xf32, #tpu.memory_space<vmem>>, vector<8x128xf32>
    tpu.vector_store %arg15[%c0_122, %c128_123], %167 {strides = array<i32>} : memref<8x384xf32, #tpu.memory_space<vmem>>, vector<8x128xf32>,
    %c0_124 = arith.constant 0 : index
    %c512_125 = arith.constant 512 : index
    %169 = vector.load %arg14[%c0_124, %c512_125] : memref<8x896xf32, #tpu.memory_space<vmem>>, vector<8x384xf32>
    %cst_126 = arith.constant dense<0.000000e+00> : vector<8x128xf32>
    %170 = tpu.matmul %169, %153, %cst_126 {dimension_numbers = #tpu.dot_dimension_numbers<[1], [0], [0], [1], [0, 0, 1, 1], [], []>} : vector<8x384xf32>, vector<384x128xf32>, vector<8x128xf32> -> vector<8x128xf32>
    %171 = vector.broadcast %154 : vector<1x128xf32> to vector<8x128xf32>
    %172 = arith.addf %170, %171 : vector<8x128xf32>
    %cst_127 = arith.constant 0.000000e+00 : f32
    %173 = vector.broadcast %cst_127 : f32 to vector<8x128xf32>
    %174 = arith.maximumf %172, %173 : vector<8x128xf32>
    %c0_128 = arith.constant 0 : index
    %c256_129 = arith.constant 256 : index
    %175 = vector.load %arg15[%c0_128, %c256_129] : memref<8x384xf32, #tpu.memory_space<vmem>>, vector<8x128xf32>
    tpu.vector_store %arg15[%c0_128, %c256_129], %174 {strides = array<i32>} : memref<8x384xf32, #tpu.memory_space<vmem>>, vector<8x128xf32>,
    %c0_130 = arith.constant 0 : index
    %c0_131 = arith.constant 0 : index
    %176 = vector.load %arg15[%c0_130, %c0_131] : memref<8x384xf32, #tpu.memory_space<vmem>>, vector<8x384xf32>
    %c0_132 = arith.constant 0 : index
    %c0_133 = arith.constant 0 : index
    %177 = vector.load %arg8[%c0_132, %c0_133] : memref<384x128xf32, #tpu.memory_space<vmem>>, vector<384x128xf32>
    %cst_134 = arith.constant dense<0.000000e+00> : vector<8x128xf32>
    %178 = tpu.matmul %176, %177, %cst_134 {dimension_numbers = #tpu.dot_dimension_numbers<[1], [0], [0], [1], [0, 0, 1, 1], [], []>} : vector<8x384xf32>, vector<384x128xf32>, vector<8x128xf32> -> vector<8x128xf32>
    %c0_135 = arith.constant 0 : index
    %c0_136 = arith.constant 0 : index
    %179 = vector.load %arg9[%c0_135, %c0_136] : memref<1x128xf32, #tpu.memory_space<vmem>>, vector<1x128xf32>
    %180 = vector.broadcast %179 : vector<1x128xf32> to vector<8x128xf32>
    %181 = arith.addf %178, %180 : vector<8x128xf32>
    %cst_137 = arith.constant 0.000000e+00 : f32
    %182 = vector.broadcast %cst_137 : f32 to vector<8x128xf32>
    %183 = arith.maximumf %181, %182 : vector<8x128xf32>
    %c0_138 = arith.constant 0 : index
    %c0_139 = arith.constant 0 : index
    %184 = vector.load %arg10[%c0_138, %c0_139] : memref<128x128xf32, #tpu.memory_space<vmem>>, vector<128x128xf32>
    %cst_140 = arith.constant dense<0.000000e+00> : vector<8x128xf32>
    %185 = tpu.matmul %183, %184, %cst_140 {dimension_numbers = #tpu.dot_dimension_numbers<[1], [0], [0], [1], [0, 0, 1, 1], [], []>} : vector<8x128xf32>, vector<128x128xf32>, vector<8x128xf32> -> vector<8x128xf32>
    %c0_141 = arith.constant 0 : index
    %c0_142 = arith.constant 0 : index
    %186 = vector.load %arg11[%c0_141, %c0_142] : memref<1x128xf32, #tpu.memory_space<vmem>>, vector<1x128xf32>
    %187 = vector.broadcast %186 : vector<1x128xf32> to vector<8x128xf32>
    %188 = arith.addf %185, %187 : vector<8x128xf32>
    %c0_143 = arith.constant 0 : index
    %c0_144 = arith.constant 0 : index
    %189 = vector.load %arg12[%c0_143, %c0_144] : memref<8x128xf32, #tpu.memory_space<vmem>>, vector<8x128xf32>
    tpu.vector_store %arg12[%c0_143, %c0_144], %188 {strides = array<i32>} : memref<8x128xf32, #tpu.memory_space<vmem>>, vector<8x128xf32>,
    return
  }
  func.func @transform_0(%arg0: i32) -> (i32, i32) {
    %c0_i32 = arith.constant 0 : i32
    %c0_i32_0 = arith.constant 0 : i32
    return %arg0, %c0_i32 : i32, i32
  }
  func.func @transform_1(%arg0: i32) -> (i32, i32) {
    %c0_i32 = arith.constant 0 : i32
    %c0_i32_0 = arith.constant 0 : i32
    %c0_i32_1 = arith.constant 0 : i32
    return %c0_i32, %c0_i32_0 : i32, i32
  }
  func.func @transform_2(%arg0: i32) -> (i32, i32) {
    %c0_i32 = arith.constant 0 : i32
    %c0_i32_0 = arith.constant 0 : i32
    %c0_i32_1 = arith.constant 0 : i32
    return %c0_i32, %c0_i32_0 : i32, i32
  }
  func.func @transform_3(%arg0: i32) -> (i32, i32) {
    %c0_i32 = arith.constant 0 : i32
    %c0_i32_0 = arith.constant 0 : i32
    %c0_i32_1 = arith.constant 0 : i32
    return %c0_i32, %c0_i32_0 : i32, i32
  }
  func.func @transform_4(%arg0: i32) -> (i32, i32) {
    %c0_i32 = arith.constant 0 : i32
    %c0_i32_0 = arith.constant 0 : i32
    %c0_i32_1 = arith.constant 0 : i32
    return %c0_i32, %c0_i32_0 : i32, i32
  }
  func.func @transform_5(%arg0: i32) -> (i32, i32) {
    %c0_i32 = arith.constant 0 : i32
    %c0_i32_0 = arith.constant 0 : i32
    %c0_i32_1 = arith.constant 0 : i32
    return %c0_i32, %c0_i32_0 : i32, i32
  }
  func.func @transform_6(%arg0: i32) -> (i32, i32) {
    %c0_i32 = arith.constant 0 : i32
    %c0_i32_0 = arith.constant 0 : i32
    %c0_i32_1 = arith.constant 0 : i32
    return %c0_i32, %c0_i32_0 : i32, i32
  }
  func.func @transform_7(%arg0: i32) -> (i32, i32) {
    %c0_i32 = arith.constant 0 : i32
    %c0_i32_0 = arith.constant 0 : i32
    %c0_i32_1 = arith.constant 0 : i32
    return %c0_i32, %c0_i32_0 : i32, i32
  }
  func.func @transform_8(%arg0: i32) -> (i32, i32) {
    %c0_i32 = arith.constant 0 : i32
    %c0_i32_0 = arith.constant 0 : i32
    %c0_i32_1 = arith.constant 0 : i32
    return %c0_i32, %c0_i32_0 : i32, i32
  }
  func.func @transform_9(%arg0: i32) -> (i32, i32) {
    %c0_i32 = arith.constant 0 : i32
    %c0_i32_0 = arith.constant 0 : i32
    %c0_i32_1 = arith.constant 0 : i32
    return %c0_i32, %c0_i32_0 : i32, i32
  }
  func.func @transform_10(%arg0: i32) -> (i32, i32) {
    %c0_i32 = arith.constant 0 : i32
    %c0_i32_0 = arith.constant 0 : i32
    %c0_i32_1 = arith.constant 0 : i32
    return %c0_i32, %c0_i32_0 : i32, i32
  }
  func.func @transform_11(%arg0: i32) -> (i32, i32) {
    %c0_i32 = arith.constant 0 : i32
    %c0_i32_0 = arith.constant 0 : i32
    return %arg0, %c0_i32 : i32, i32
  }
}

</mosaic_0001>

<bundles_post_ra>
// kernel: vconv_encoder_forward.1
= control target key start
LH: loop header
LB: loop body
LE: loop exit
PB: predicated region body
PF: predicated region fallthrough
CT: control target
= control target key end

     0   :  { %16 = vsyncpa [#allocation6], 0  ;;  %s6504_s0 = inlined_call_operand.vmem [shape: f32[8,840], index: 0, kind: input, shape index: {}]   ;;  %s6505_s1 = inlined_call_operand.vmem [shape: f32[84,128], index: 1, kind: input, shape index: {}]   ;;  %s6506_s2 = inlined_call_operand.vmem [shape: f32[1,128], index: 2, kind: input, shape index: {}]   ;;  %s6507_s3 = inlined_call_operand.vmem [shape: f32[384,128], index: 3, kind: input, shape index: {}]   ;;  %s6508_s4 = inlined_call_operand.vmem [shape: f32[1,128], index: 4, kind: input, shape index: {}]   ;;  %s6509_s5 = inlined_call_operand.vmem [shape: f32[384,128], index: 5, kind: input, shape index: {}]   ;;  %s6510_s6 = inlined_call_operand.vmem [shape: f32[1,128], index: 6, kind: input, shape index: {}]   ;;  %s6511_s7 = inlined_call_operand.hbm [shape: f32[384,128], index: 7, kind: input, shape index: {}]   ;;  %s6512_s8 = inlined_call_operand.vmem [shape: f32[1,128], index: 8, kind: input, shape index: {}]   ;;  %s6513_s9 = inlined_call_operand.hbm [shape: f32[128,128], index: 9, kind: input, shape index: {}]   ;;  %s6514_s10 = inlined_call_operand.vmem [shape: f32[1,128], index: 10, kind: input, shape index: {}]   ;;  %s6515_s11 = inlined_call_operand.vmem [shape: f32[8,128], index: 11, kind: output, shape index: {}]  }
   0x1   :  { %17 = vsyncpa [#allocation8], 0  ;;  %s4719_s17 = smov [#allocation5]  }
   0x2   :  { %s37_s18 = sshll.u32 %s4719_s17, 4  ;;  %s38_s18 = int_to_ptr.vmem [resolvable:$true] %s37_s18 }
   0x3   :  { %s4683_s19 = scalar_lea.vmem %s38_s18, 6144  ;;  %p4688_p1 = scmp.lt.s32.totalorder %s38_s18, %s38_s18 }
   0x4   :  { %p4684_p0 = scmp.ne.s32.totalorder %s38_s18, %s4683_s19  ;;  %p4689_p2 = scmp.lt.s32.totalorder %s4683_s19, %s4683_s19 }
   0x6   :  { %p4690_p3 = por %p4689_p2, %p4688_p1 }
   0x8   :  { %p4691_p4 = pnand %p4690_p3, %p4684_p0 }
   0xa   :  { %4694 = shalt.err (!%p4691_p4)
}
   0xb   :  { %s4720_s20 = smov 128   ;;  %s4721_s21 = smov 8  }
   0xc   :  { %43 = dma.hbm_to_vmem [thread:$0]  %s6511_s7, 6144, %s38_s18, [#allocation6], %s4720_s20, %s4720_s20, %s4721_s21  }
   0xd   :  { %s4722_s24 = smov [#allocation7]  }
   0xe   :  { %s51_s25 = sshll.u32 %s4722_s24, 4  ;;  %s52_s25 = int_to_ptr.vmem [resolvable:$true] %s51_s25 }
   0xf   :  { %s4703_s26 = scalar_lea.vmem %s52_s25, 2048  ;;  %p4708_p6 = scmp.lt.s32.totalorder %s52_s25, %s52_s25 }
  0x10   :  { %p4704_p5 = scmp.ne.s32.totalorder %s52_s25, %s4703_s26  ;;  %p4709_p7 = scmp.lt.s32.totalorder %s4703_s26, %s4703_s26 }
  0x12   :  { %p4710_p8 = por %p4709_p7, %p4708_p6 }
  0x14   :  { %p4711_p9 = pnand %p4710_p8, %p4704_p5 }
  0x16   :  { %4714 = shalt.err (!%p4711_p9)
}
  0x17   :  { %57 = dma.hbm_to_vmem [thread:$0]  %s6513_s9, 2048, %s52_s25, [#allocation8], %s4720_s20, %s4720_s20, %s4721_s21  }
  0x18   :  { %4715 = dma.done.wait [#allocation6], 6144  }
  0x19   :  { %4716 = vsyncadd [#allocation6], 4294961152 }
  0x1a   :  { %4717 = dma.done.wait [#allocation8], 2048  }
  0x1b   :  { %4718 = vsyncadd [#allocation8], 4294965248  ;;  %v4723_v0 = vmov 0.0   ;;  %vm4724_vm0 = vmmov 0   ;;  %vm90_vm1 = vcmask 1043456   ;;  %v4814_v1 = vld [vmem:[%s6504_s0] sm:$0xff] }
  0x1c   :  { %3883 = vmatprep.subr.mxu1 %v4723_v0  ;;  %3933 = vmatprep.subr.mxu0 %v4723_v0  ;;  %s4725_s9 = smov 16   ;;  %s4726_s30 = smov 72   ;;  %v4821_v2 = vld [vmem:[%s6505_s1 + $0x50] sm:$0xf]  ;;  %v251_v3 = vld [vmem:[%s6504_s0 + $0x8] sm:$0xff]  ;;  %v4841_v5 = vld [vmem:[%s6505_s1 + $0x40] sm:$0xff] }
  0x1d   :  { %3905 = vmatprep.mubr.msk.f32.mxu1 %vm4724_vm0, %v4723_v0  ;;  %3955 = vmatprep.mubr.msk.f32.mxu0 %vm4724_vm0, %v4723_v0  ;;  %v4831_v4 = vld [vmem:[%s6505_s1 + $0x48] sm:$0xff]  ;;  %v4850_v6 = vld [vmem:[%s6505_s1 + $0x38] sm:$0xff]  ;;  %s4727_s23 = smov 88   ;;  %s4728_s24 = smov 32   ;;  %v4858_v7 = vld [vmem:[%s6505_s1 + $0x30] sm:$0xff]  ;;  %vm86_vm2 = vcmask 687104  }
  0x1e   :  { %254 = vrot.lane.b32.xlu1 %v4814_v1, %s4725_s9  ;;  %170 = vrot.lane.b32.xlu0 %v4814_v1, %s4726_s30  ;;  %v413_v8 = vld [vmem:[%s6504_s0 + $0x10] sm:$0xff]  ;;  %v4871_v9 = vld [vmem:[%s6505_s1 + $0x28] sm:$0xff]  ;;  %s4730_s15 = smov 48   ;;  %s4736_s13 = smov 40   ;;  %vm258_vm3 = vcmask 130048   ;;  %vm174_vm4 = vcmask 588800  }
  0x1f   :  { %3884 = vmatpush3.msk.msra.mxu1 %vm90_vm1, %v4821_v2  ;;  %3934 = vmatpush3.msk.msra.mxu0 %vm90_vm1, %v4821_v2  ;;  %v575_v10 = vld [vmem:[%s6504_s0 + $0x18] sm:$0xff]  ;;  %v4883_v11 = vld [vmem:[%s6505_s1 + $0x20] sm:$0xff]  ;;  %v4899_v13 = vld [vmem:[%s6505_s1 + $0x10] sm:$0xff]  ;;  %vm420_vm5 = vcmask 261120   ;;  %vm582_vm6 = vcmask 392192   ;;  %vm744_vm7 = vcmask 523264  }
  0x20   :  { %3885 = vmatprep.subr.mxu1 %v4723_v0  ;;  %3935 = vmatprep.subr.mxu0 %v4723_v0  ;;  %v4891_v12 = vld [vmem:[%s6505_s1 + $0x18] sm:$0xff]  ;;  %v4908_v14 = vld [vmem:[%s6505_s1 + $0x8] sm:$0xff]  ;;  %v737_v15 = vld [vmem:[%s6504_s0 + $0x20] sm:$0xff]  ;;  %vm912_vm8 = vcmask 654336   ;;  %vm828_vm9 = vcmask 64512   ;;  %vm996_vm10 = vcmask 195584  }
  0x21   :  { %3886 = vmatpush3.msra.mxu1 %v4831_v4  ;;  %3936 = vmatpush3.msra.mxu0 %v4831_v4  ;;  %v4918_v16 = vld [vmem:[%s6505_s1] sm:$0xff]  ;;  %s4733_s1 = smov 80   ;;  %v905_v17 = vld [vmem:[%s6504_s0 + $0x28] sm:$0xff]  ;;  %v1151_v18 = vld [vmem:[%s6504_s0 + $0x30] sm:$0xff]  ;;  %vm1158_vm11 = vcmask 326656  }
  0x22   :  { %256 = vrot.lane.b32.xlu1 %v251_v3, %s4725_s9  ;;  %172 = vrot.lane.b32.xlu0 %v251_v3, %s4726_s30  ;;  %s4729_s9 = smov 104   ;;  %v5215_v46 = vld [vmem:[%s6507_s3 + $0xf8] sm:$0xff]  ;;  %v5232_v49 = vld [vmem:[%s6507_s3 + $0xf0] sm:$0xff] }
  0x23   :  { %3887 = vmatprep.subr.mxu1 %v4723_v0  ;;  %3937 = vmatprep.subr.mxu0 %v4723_v0  ;;  %v5225_v48 = vld [vmem:[%s6507_s3 + $0x78] sm:$0xff]  ;;  %v5239_v50 = vld [vmem:[%s6507_s3 + $0x70] sm:$0xff]  ;;  %v5246_v51 = vld [vmem:[%s6507_s3 + $0xe8] sm:$0xff] }
  0x24   :  { %3888 = vmatpush3.msra.mxu1 %v4841_v5  ;;  %3938 = vmatpush3.msra.mxu0 %v4841_v5  ;;  %v5253_v53 = vld [vmem:[%s6507_s3 + $0x68] sm:$0xff]  ;;  %v5260_v54 = vld [vmem:[%s6507_s3 + $0xe0] sm:$0xff]  ;;  %v5274_v57 = vld [vmem:[%s6507_s3 + $0xd8] sm:$0xff] }
  0x25   :  { %3889 = vmatprep.subr.mxu1 %v4723_v0  ;;  %3939 = vmatprep.subr.mxu0 %v4723_v0  ;;  %v5267_v56 = vld [vmem:[%s6507_s3 + $0x60] sm:$0xff]  ;;  %v5282_v58 = vld [vmem:[%s6507_s3 + $0x58] sm:$0xff]  ;;  %v5289_v59 = vld [vmem:[%s6507_s3 + $0xd0] sm:$0xff] }
  0x26   :  { %336 = vrot.lane.b32.xlu0 %v251_v3, %s4727_s23  ;;  %416 = vrot.lane.b32.xlu1 %v251_v3, %s4728_s24  ;;  %s4731_s23 = smov 120   ;;  %v5296_v60 = vld [vmem:[%s6507_s3 + $0x50] sm:$0xff]  ;;  %v5304_v61 = vld [vmem:[%s6507_s3 + $0xc8] sm:$0xff] }
  0x27   :  { %3890 = vmatpush3.msra.mxu1 %v4850_v6  ;;  %3940 = vmatpush3.msra.mxu0 %v4850_v6  ;;  %v5311_v62 = vld [vmem:[%s6507_s3 + $0x48] sm:$0xff]  ;;  %v5318_v63 = vld [vmem:[%s6507_s3 + $0xc0] sm:$0xff]  ;;  %v5339_v3 = vld [vmem:[%s6507_s3 + $0x38] sm:$0xff] }
  0x28   :  { %3891 = vmatprep.subr.mxu1 %v4723_v0  ;;  %3941 = vmatprep.subr.mxu0 %v4723_v0 }
  0x29   :  { %3892 = vmatpush3.msra.mxu1 %v4858_v7  ;;  %3942 = vmatpush3.msra.mxu0 %v4858_v7 }
  0x2a   :  { %418 = vrot.lane.b32.xlu0 %v413_v8, %s4728_s24  ;;  %498 = vrot.lane.b32.xlu1 %v413_v8, %s4729_s9  ;;  %s4732_s24 = smov 64   ;;  %s4735_s9 = smov 96  }
  0x2b   :  { %3893 = vmatprep.subr.mxu1 %v4723_v0  ;;  %3943 = vmatprep.subr.mxu0 %v4723_v0 }
  0x2c   :  { %3894 = vmatpush3.msra.mxu1 %v4871_v9  ;;  %3944 = vmatpush3.msra.mxu0 %v4871_v9 }
  0x2d   :  { %3895 = vmatprep.subr.mxu1 %v4723_v0  ;;  %3945 = vmatprep.subr.mxu0 %v4723_v0 }
  0x2e   :  { %580 = vrot.lane.b32.xlu1 %v575_v10, %s4730_s15  ;;  %578 = vrot.lane.b32.xlu0 %v413_v8, %s4730_s15  ;;  %v5367_v8 = vld [vmem:[%s6507_s3 + $0x28] sm:$0xff] }
  0x2f   :  { %3896 = vmatpush3.msra.mxu1 %v4883_v11  ;;  %3946 = vmatpush3.msra.mxu0 %v4883_v11 }
  0x30   :  { %3897 = vmatprep.subr.mxu1 %v4723_v0  ;;  %3947 = vmatprep.subr.mxu0 %v4723_v0 }
  0x31   :  { %3898 = vmatpush3.msra.mxu1 %v4891_v12  ;;  %3948 = vmatpush3.msra.mxu0 %v4891_v12 }
  0x32   :  { %3899 = vmatprep.subr.mxu1 %v4723_v0  ;;  %660 = vrot.lane.b32.xlu0 %v575_v10, %s4731_s23 }
  0x33   :  { %3900 = vmatpush3.msra.mxu1 %v4899_v13  ;;  %740 = vrot.lane.b32.xlu1 %v575_v10, %s4732_s24 }
  0x34   :  { %3901 = vmatprep.subr.mxu1 %v4723_v0  ;;  %3949 = vmatprep.subr.mxu0 %v4723_v0 }
  0x35   :  { %3902 = vmatpush3.msra.mxu1 %v4908_v14  ;;  %3950 = vmatpush3.msra.mxu0 %v4899_v13 }
  0x36   :  { %3903 = vmatprep.subr.mxu1 %v4723_v0  ;;  %742 = vrot.lane.b32.xlu0 %v737_v15, %s4732_s24 }
  0x37   :  { %3904 = vmatpush3.msra.mxu1 %v4918_v16  ;;  %824 = vrot.lane.b32.xlu1 %v575_v10, %s4721_s21  ;;  %v5381_v10 = vld [vmem:[%s6507_s3 + $0x20] sm:$0xff] }
  0x38   :  { %3906 = vmatmul.mubr.msk.f32.vlgmr.msra.gmra.mxu1 %vm86_vm2, %v4814_v1  ;;  %3908 = vmatprep.subr.mxu1 %v4723_v0  ;;  %v5325_v1 = vld [vmem:[%s6507_s3 + $0x40] sm:$0xff] }
  0x39   :  { %3909 = vmatpush3.msk.msra.mxu1 %vm90_vm1, %v4821_v2  ;;  %3951 = vmatprep.subr.mxu0 %v4723_v0 }
  0x3a   :  { %3910 = vmatprep.subr.mxu1 %v4723_v0  ;;  %826 = vrot.lane.b32.xlu0 %v737_v15, %s4721_s21  ;;  %s4734_s21 = smov 24  }
  0x3b   :  { %3911 = vmatpush3.msra.mxu1 %v4831_v4  ;;  %908 = vrot.lane.b32.xlu1 %v737_v15, %s4733_s1 }
  0x3c   :  { %3912 = vmatprep.subr.mxu1 %v4723_v0  ;;  %3952 = vmatpush3.msra.mxu0 %v4908_v14 }
  0x3d   :  { %3913 = vmatpush3.msra.mxu1 %v4841_v5  ;;  %3953 = vmatprep.subr.mxu0 %v4723_v0 }
  0x3e   :  { %3914 = vmatprep.subr.mxu1 %v4723_v0  ;;  %910 = vrot.lane.b32.xlu0 %v905_v17, %s4733_s1 }
  0x3f   :  { %3915 = vmatpush3.msra.mxu1 %v4850_v6  ;;  %3930 = vmatprep.mubr.msk.f32.mxu1 %vm4724_vm0, %v4723_v0 }
  0x40   :  { %3916 = vmatprep.subr.mxu1 %v4723_v0  ;;  %3954 = vmatpush3.msra.mxu0 %v4918_v16 }
  0x41   :  { %3917 = vmatpush3.msra.mxu1 %v4858_v7  ;;  %3983 = vmatprep.subr.mxu0 %v4723_v0 }
  0x42   :  { %3918 = vmatprep.subr.mxu1 %v4723_v0  ;;  %992 = vrot.lane.b32.xlu1 %v737_v15, %s4734_s21  ;;  %v5393_v15 = vld [vmem:[%s6506_s2] ss:$0 sm:$0xff] }
  0x43   :  { %3919 = vmatpush3.msra.mxu1 %v4871_v9  ;;  %994 = vrot.lane.b32.xlu0 %v905_v17, %s4734_s21 }
  0x44   :  { %3920 = vmatprep.subr.mxu1 %v4723_v0 }
  0x45   :  { %3921 = vmatpush3.msra.mxu1 %v4883_v11 }
  0x46   :  { %3922 = vmatprep.subr.mxu1 %v4723_v0  ;;  %1074 = vrot.lane.b32.xlu1 %v905_v17, %s4735_s9 }
  0x47   :  { %3923 = vmatpush3.msra.mxu1 %v4891_v12  ;;  %1154 = vrot.lane.b32.xlu0 %v905_v17, %s4736_s13  ;;  %v5407_v17 = vld [vmem:[%s6507_s3 + $0x90] sm:$0xff] }
  0x48   :  { %3924 = vmatprep.subr.mxu1 %v4723_v0 }
  0x49   :  { %3925 = vmatpush3.msra.mxu1 %v4899_v13 }
  0x4a   :  { %3926 = vmatprep.subr.mxu1 %v4723_v0  ;;  %1156 = vrot.lane.b32.xlu1 %v1151_v18, %s4736_s13 }
  0x4b   :  { %3927 = vmatpush3.msra.mxu1 %v4908_v14 }
  0x4c   :  { %3928 = vmatprep.subr.mxu1 %v4723_v0 }
  0x4d   :  { %3929 = vmatpush3.msra.mxu1 %v4918_v16 }
  0x4e   :  { %3958 = vmatprep.subr.mxu1 %v4723_v0 }
  0x90   :  { %v255_v19 = vpop.permute.xlu1 %254  ;;  %v171_v20 = vpop.permute.xlu0 %170 }
  0x94   :  { %v257_v21 = vpop.permute.xlu1 %256  ;;  %v173_v22 = vpop.permute.xlu0 %172 }
  0x95   :  { %v259_v23 = vsel %vm258_vm3, %v255_v19, %v257_v21  ;;  %v175_v24 = vsel %vm174_vm4, %v171_v20, %v173_v22  ;;  %v5416_v19 = vld [vmem:[%s6507_s3 + $0x10] sm:$0xff]  ;;  %v5423_v21 = vld [vmem:[%s6507_s3 + $0x88] sm:$0xff] }
  0x96   :  { %3931 = vmatmul.mubr.msk.f32.vlgmr.msra.gmra.mxu1 %vm86_vm2, %v175_v24  ;;  %3956 = vmatmul.mubr.msk.f32.vlgmr.msra.gmra.mxu0 %vm86_vm2, %v259_v23  ;;  %v5439_v24 = vld [vmem:[%s6507_s3 + $0x80] sm:$0xff] }
  0x97   :  { %3959 = vmatpush3.msk.msra.mxu1 %vm90_vm1, %v4821_v2  ;;  %3984 = vmatpush3.msk.msra.mxu0 %vm90_vm1, %v4821_v2 }
  0x98   :  { %3960 = vmatprep.subr.mxu1 %v4723_v0  ;;  %3985 = vmatprep.subr.mxu0 %v4723_v0  ;;  %v337_v25 = vpop.permute.xlu0 %336  ;;  %v417_v26 = vpop.permute.xlu1 %416 }
  0x99   :  { %3961 = vmatpush3.msra.mxu1 %v4831_v4  ;;  %3986 = vmatpush3.msra.mxu0 %v4831_v4 }
  0x9a   :  { %3962 = vmatprep.subr.mxu1 %v4723_v0  ;;  %3987 = vmatprep.subr.mxu0 %v4723_v0 }
  0x9b   :  { %3963 = vmatpush3.msra.mxu1 %v4841_v5  ;;  %3988 = vmatpush3.msra.mxu0 %v4841_v5 }
  0x9c   :  { %3964 = vmatprep.subr.mxu1 %v4723_v0  ;;  %3989 = vmatprep.subr.mxu0 %v4723_v0  ;;  %v419_v27 = vpop.permute.xlu0 %418  ;;  %v499_v29 = vpop.permute.xlu1 %498 }
  0x9d   :  { %3965 = vmatpush3.msra.mxu1 %v4850_v6  ;;  %3990 = vmatpush3.msra.mxu0 %v4850_v6  ;;  %v421_v28 = vsel %vm420_vm5, %v417_v26, %v419_v27  ;;  %v5471_v26 = vld [vmem:[%s6507_s3 + $0x168] sm:$0xff]  ;;  %v5480_v27 = vld [vmem:[%s6507_s3 + $0x160] sm:$0xff] }
  0x9e   :  { %3966 = vmatprep.subr.mxu1 %v4723_v0  ;;  %3991 = vmatprep.subr.mxu0 %v4723_v0 }
  0x9f   :  { %3967 = vmatpush3.msra.mxu1 %v4858_v7  ;;  %3992 = vmatpush3.msra.mxu0 %v4858_v7 }
  0xa0   :  { %3968 = vmatprep.subr.mxu1 %v4723_v0  ;;  %3993 = vmatprep.subr.mxu0 %v4723_v0  ;;  %v581_v30 = vpop.permute.xlu1 %580  ;;  %v579_v31 = vpop.permute.xlu0 %578 }
  0xa1   :  { %3969 = vmatpush3.msra.mxu1 %v4871_v9  ;;  %3994 = vmatpush3.msra.mxu0 %v4871_v9  ;;  %v583_v32 = vsel %vm582_vm6, %v579_v31, %v581_v30  ;;  %v5507_v30 = vld [vmem:[%s6507_s3 + $0x148] sm:$0xff]  ;;  %v5516_v31 = vld [vmem:[%s6507_s3 + $0x140] sm:$0xff] }
  0xa2   :  { %3970 = vmatprep.subr.mxu1 %v4723_v0  ;;  %3995 = vmatprep.subr.mxu0 %v4723_v0 }
  0xa3   :  { %3971 = vmatpush3.msra.mxu1 %v4883_v11  ;;  %3996 = vmatpush3.msra.mxu0 %v4883_v11 }
  0xa4   :  { %3972 = vmatprep.subr.mxu1 %v4723_v0  ;;  %3997 = vmatprep.subr.mxu0 %v4723_v0  ;;  %v661_v33 = vpop.permute.xlu0 %660 }
  0xa5   :  { %3973 = vmatpush3.msra.mxu1 %v4891_v12  ;;  %3998 = vmatpush3.msra.mxu0 %v4891_v12  ;;  %v741_v34 = vpop.permute.xlu1 %740 }
  0xa6   :  { %3974 = vmatprep.subr.mxu1 %v4723_v0  ;;  %3999 = vmatprep.subr.mxu0 %v4723_v0 }
  0xa7   :  { %3975 = vmatpush3.msra.mxu1 %v4899_v13  ;;  %4000 = vmatpush3.msra.mxu0 %v4899_v13 }
  0xa8   :  { %3976 = vmatprep.subr.mxu1 %v4723_v0  ;;  %4001 = vmatprep.subr.mxu0 %v4723_v0  ;;  %v743_v35 = vpop.permute.xlu0 %742 }
  0xa9   :  { %3977 = vmatpush3.msra.mxu1 %v4908_v14  ;;  %4002 = vmatpush3.msra.mxu0 %v4908_v14  ;;  %v745_v36 = vsel %vm744_vm7, %v741_v34, %v743_v35  ;;  %v825_v37 = vpop.permute.xlu1 %824  ;;  %v5543_v34 = vld [vmem:[%s6507_s3 + $0x128] sm:$0xff]  ;;  %v5552_v35 = vld [vmem:[%s6507_s3 + $0x120] sm:$0xff] }
  0xaa   :  { %3978 = vmatprep.subr.mxu1 %v4723_v0  ;;  %3980 = vmatprep.mubr.msk.f32.mxu1 %vm4724_vm0, %v4723_v0 }
  0xab   :  { %3979 = vmatpush3.msra.mxu1 %v4918_v16  ;;  %4003 = vmatprep.subr.mxu0 %v4723_v0 }
  0xac   :  { %3981 = vmatmul.mubr.msk.f32.vlgmr.msra.gmra.mxu1 %vm86_vm2, %v337_v25  ;;  %4004 = vmatpush3.msra.mxu0 %v4918_v16  ;;  %v827_v38 = vpop.permute.xlu0 %826  ;;  %v5454_v25 = vld [vmem:[%s6507_s3 + $0x178] sm:$0xff] }
  0xad   :  { %4005 = vmatprep.mubr.msk.f32.mxu0 %vm4724_vm0, %v4723_v0  ;;  %4008 = vmatprep.subr.mxu1 %v4723_v0  ;;  %v909_v39 = vpop.permute.xlu1 %908  ;;  %v829_v42 = vsel %vm828_vm9, %v825_v37, %v827_v38  ;;  %v5570_v37 = vld [vmem:[%s6507_s3 + $0x110] sm:$0xff]  ;;  %v5579_v38 = vld [vmem:[%s6507_s3 + $0x108] sm:$0xff] }
  0xae   :  { %4006 = vmatmul.mubr.msk.f32.vlgmr.msra.gmra.mxu0 %vm86_vm2, %v421_v28  ;;  %4009 = vmatpush3.msk.msra.mxu1 %vm90_vm1, %v4821_v2  ;;  %v5489_v28 = vld [vmem:[%s6507_s3 + $0x158] sm:$0xff] }
  0xaf   :  { %4033 = vmatprep.subr.mxu0 %v4723_v0  ;;  %4010 = vmatprep.subr.mxu1 %v4723_v0 }
  0xb0   :  { %4034 = vmatpush3.msk.msra.mxu0 %vm90_vm1, %v4821_v2  ;;  %4011 = vmatpush3.msra.mxu1 %v4831_v4  ;;  %v911_v40 = vpop.permute.xlu0 %910 }
  0xb1   :  { %4035 = vmatprep.subr.mxu0 %v4723_v0  ;;  %4012 = vmatprep.subr.mxu1 %v4723_v0  ;;  %v913_v41 = vsel %vm912_vm8, %v909_v39, %v911_v40  ;;  %v5588_v39 = vld [vmem:[%s6507_s3 + $0x100] sm:$0xff] }
  0xb2   :  { %4036 = vmatpush3.msra.mxu0 %v4831_v4  ;;  %4013 = vmatpush3.msra.mxu1 %v4841_v5 }
  0xb3   :  { %4037 = vmatprep.subr.mxu0 %v4723_v0  ;;  %4014 = vmatprep.subr.mxu1 %v4723_v0 }
  0xb4   :  { %4038 = vmatpush3.msra.mxu0 %v4841_v5  ;;  %4015 = vmatpush3.msra.mxu1 %v4850_v6  ;;  %v993_v45 = vpop.permute.xlu1 %992 }
  0xb5   :  { %4039 = vmatprep.subr.mxu0 %v4723_v0  ;;  %4016 = vmatprep.subr.mxu1 %v4723_v0  ;;  %v995_v52 = vpop.permute.xlu0 %994 }
  0xb6   :  { %4040 = vmatpush3.msra.mxu0 %v4850_v6  ;;  %4017 = vmatpush3.msra.mxu1 %v4858_v7  ;;  %v997_v55 = vsel %vm996_vm10, %v993_v45, %v995_v52 }
  0xb7   :  { %4041 = vmatprep.subr.mxu0 %v4723_v0  ;;  %4018 = vmatprep.subr.mxu1 %v4723_v0 }
  0xb8   :  { %4042 = vmatpush3.msra.mxu0 %v4858_v7  ;;  %4019 = vmatpush3.msra.mxu1 %v4871_v9  ;;  %v1075_v47 = vpop.permute.xlu1 %1074 }
  0xb9   :  { %4043 = vmatprep.subr.mxu0 %v4723_v0  ;;  %4020 = vmatprep.subr.mxu1 %v4723_v0  ;;  %v1155_v20 = vpop.permute.xlu0 %1154 }
  0xba   :  { %4044 = vmatpush3.msra.mxu0 %v4871_v9  ;;  %4021 = vmatpush3.msra.mxu1 %v4883_v11 }
  0xbb   :  { %4045 = vmatprep.subr.mxu0 %v4723_v0  ;;  %4022 = vmatprep.subr.mxu1 %v4723_v0 }
  0xbc   :  { %4046 = vmatpush3.msra.mxu0 %v4883_v11  ;;  %4023 = vmatpush3.msra.mxu1 %v4891_v12 }
  0xbd   :  { %4047 = vmatprep.subr.mxu0 %v4723_v0  ;;  %4024 = vmatprep.subr.mxu1 %v4723_v0 }
  0xbe   :  { %4048 = vmatpush3.msra.mxu0 %v4891_v12  ;;  %4025 = vmatpush3.msra.mxu1 %v4899_v13 }
  0xbf   :  { %4049 = vmatprep.subr.mxu0 %v4723_v0  ;;  %4026 = vmatprep.subr.mxu1 %v4723_v0 }
  0xc0   :  { %4050 = vmatpush3.msra.mxu0 %v4899_v13  ;;  %4027 = vmatpush3.msra.mxu1 %v4908_v14 }
  0xc1   :  { %4051 = vmatprep.subr.mxu0 %v4723_v0  ;;  %4028 = vmatprep.subr.mxu1 %v4723_v0 }
  0xc2   :  { %4052 = vmatpush3.msra.mxu0 %v4908_v14  ;;  %4029 = vmatpush3.msra.mxu1 %v4918_v16 }
  0xc3   :  { %4030 = vmatprep.mubr.msk.f32.mxu1 %vm4724_vm0, %v4723_v0  ;;  %4053 = vmatprep.subr.mxu0 %v4723_v0 }
  0xc4   :  { %4031 = vmatmul.mubr.msk.f32.vlgmr.msra.gmra.mxu1 %vm86_vm2, %v499_v29  ;;  %4054 = vmatpush3.msra.mxu0 %v4918_v16  ;;  %v5498_v29 = vld [vmem:[%s6507_s3 + $0x150] sm:$0xff] }
  0xc5   :  { %4055 = vmatprep.mubr.msk.f32.mxu0 %vm4724_vm0, %v4723_v0  ;;  %4083 = vmatprep.subr.mxu0 %v4723_v0 }
  0xc6   :  { %4056 = vmatmul.mubr.msk.f32.vlgmr.msra.gmra.mxu0 %vm86_vm2, %v583_v32  ;;  %4058 = vmatprep.subr.mxu1 %v4723_v0  ;;  %v5525_v32 = vld [vmem:[%s6507_s3 + $0x138] sm:$0xff] }
  0xc7   :  { %4084 = vmatpush3.msk.msra.mxu0 %vm90_vm1, %v4821_v2  ;;  %4059 = vmatpush3.msk.msra.mxu1 %vm90_vm1, %v4821_v2 }
  0xc8   :  { %4085 = vmatprep.subr.mxu0 %v4723_v0  ;;  %4060 = vmatprep.subr.mxu1 %v4723_v0 }
  0xc9   :  { %4086 = vmatpush3.msra.mxu0 %v4831_v4  ;;  %4061 = vmatpush3.msra.mxu1 %v4831_v4 }
  0xca   :  { %4087 = vmatprep.subr.mxu0 %v4723_v0  ;;  %4062 = vmatprep.subr.mxu1 %v4723_v0 }
  0xcb   :  { %4088 = vmatpush3.msra.mxu0 %v4841_v5  ;;  %4063 = vmatpush3.msra.mxu1 %v4841_v5 }
  0xcc   :  { %4089 = vmatprep.subr.mxu0 %v4723_v0  ;;  %4064 = vmatprep.subr.mxu1 %v4723_v0 }
  0xcd   :  { %4090 = vmatpush3.msra.mxu0 %v4850_v6  ;;  %4065 = vmatpush3.msra.mxu1 %v4850_v6 }
  0xce   :  { %4091 = vmatprep.subr.mxu0 %v4723_v0  ;;  %4066 = vmatprep.subr.mxu1 %v4723_v0 }
  0xcf   :  { %4092 = vmatpush3.msra.mxu0 %v4858_v7  ;;  %4067 = vmatpush3.msra.mxu1 %v4858_v7 }
  0xd0   :  { %4093 = vmatprep.subr.mxu0 %v4723_v0  ;;  %4068 = vmatprep.subr.mxu1 %v4723_v0 }
  0xd1   :  { %4094 = vmatpush3.msra.mxu0 %v4871_v9  ;;  %4069 = vmatpush3.msra.mxu1 %v4871_v9 }
  0xd2   :  { %4095 = vmatprep.subr.mxu0 %v4723_v0  ;;  %4070 = vmatprep.subr.mxu1 %v4723_v0 }
  0xd3   :  { %4096 = vmatpush3.msra.mxu0 %v4883_v11  ;;  %4071 = vmatpush3.msra.mxu1 %v4883_v11 }
  0xd4   :  { %4097 = vmatprep.subr.mxu0 %v4723_v0  ;;  %4072 = vmatprep.subr.mxu1 %v4723_v0 }
  0xd5   :  { %4098 = vmatpush3.msra.mxu0 %v4891_v12  ;;  %4073 = vmatpush3.msra.mxu1 %v4891_v12 }
  0xd6   :  { %4099 = vmatprep.subr.mxu0 %v4723_v0  ;;  %4074 = vmatprep.subr.mxu1 %v4723_v0 }
  0xd7   :  { %4100 = vmatpush3.msra.mxu0 %v4899_v13  ;;  %4075 = vmatpush3.msra.mxu1 %v4899_v13 }
  0xd8   :  { %4101 = vmatprep.subr.mxu0 %v4723_v0  ;;  %4105 = vmatprep.mubr.msk.f32.mxu0 %vm4724_vm0, %v4723_v0 }
  0xd9   :  { %4102 = vmatpush3.msra.mxu0 %v4908_v14  ;;  %4076 = vmatprep.subr.mxu1 %v4723_v0 }
  0xda   :  { %4103 = vmatprep.subr.mxu0 %v4723_v0  ;;  %4077 = vmatpush3.msra.mxu1 %v4908_v14 }
  0xdb   :  { %4104 = vmatpush3.msra.mxu0 %v4918_v16  ;;  %4078 = vmatprep.subr.mxu1 %v4723_v0 }
  0xdc   :  { %4133 = vmatprep.subr.mxu0 %v4723_v0  ;;  %4106 = vmatmul.mubr.msk.f32.vlgmr.msra.gmra.mxu0 %vm86_vm2, %v745_v36  ;;  %v5561_v36 = vld [vmem:[%s6507_s3 + $0x118] sm:$0xff] }
  0xdd   :  { %4134 = vmatpush3.msk.msra.mxu0 %vm90_vm1, %v4821_v2  ;;  %4079 = vmatpush3.msra.mxu1 %v4918_v16 }
  0xde   :  { %4135 = vmatprep.subr.mxu0 %v4723_v0  ;;  %4080 = vmatprep.mubr.msk.f32.mxu1 %vm4724_vm0, %v4723_v0 }
  0xdf   :  { %4136 = vmatpush3.msra.mxu0 %v4831_v4  ;;  %4081 = vmatmul.mubr.msk.f32.vlgmr.msra.gmra.mxu1 %vm86_vm2, %v661_v33  ;;  %v5534_v33 = vld [vmem:[%s6507_s3 + $0x130] sm:$0xff] }
  0xe0   :  { %4137 = vmatprep.subr.mxu0 %v4723_v0  ;;  %4108 = vmatprep.subr.mxu1 %v4723_v0 }
  0xe1   :  { %4138 = vmatpush3.msra.mxu0 %v4841_v5  ;;  %4109 = vmatpush3.msk.msra.mxu1 %vm90_vm1, %v4821_v2 }
  0xe2   :  { %4139 = vmatprep.subr.mxu0 %v4723_v0  ;;  %4110 = vmatprep.subr.mxu1 %v4723_v0 }
  0xe3   :  { %4140 = vmatpush3.msra.mxu0 %v4850_v6  ;;  %4111 = vmatpush3.msra.mxu1 %v4831_v4 }
  0xe4   :  { %4141 = vmatprep.subr.mxu0 %v4723_v0  ;;  %4112 = vmatprep.subr.mxu1 %v4723_v0 }
  0xe5   :  { %4142 = vmatpush3.msra.mxu0 %v4858_v7  ;;  %4113 = vmatpush3.msra.mxu1 %v4841_v5 }
  0xe6   :  { %4143 = vmatprep.subr.mxu0 %v4723_v0  ;;  %4114 = vmatprep.subr.mxu1 %v4723_v0 }
  0xe7   :  { %4144 = vmatpush3.msra.mxu0 %v4871_v9  ;;  %4115 = vmatpush3.msra.mxu1 %v4850_v6 }
  0xe8   :  { %4145 = vmatprep.subr.mxu0 %v4723_v0  ;;  %4116 = vmatprep.subr.mxu1 %v4723_v0 }
  0xe9   :  { %4146 = vmatpush3.msra.mxu0 %v4883_v11  ;;  %4117 = vmatpush3.msra.mxu1 %v4858_v7 }
  0xea   :  { %4147 = vmatprep.subr.mxu0 %v4723_v0  ;;  %4118 = vmatprep.subr.mxu1 %v4723_v0 }
  0xeb   :  { %4148 = vmatpush3.msra.mxu0 %v4891_v12  ;;  %4119 = vmatpush3.msra.mxu1 %v4871_v9 }
  0xec   :  { %4149 = vmatprep.subr.mxu0 %v4723_v0  ;;  %4120 = vmatprep.subr.mxu1 %v4723_v0 }
  0xed   :  { %4150 = vmatpush3.msra.mxu0 %v4899_v13  ;;  %4121 = vmatpush3.msra.mxu1 %v4883_v11 }
  0xee   :  { %4151 = vmatprep.subr.mxu0 %v4723_v0  ;;  %4122 = vmatprep.subr.mxu1 %v4723_v0 }
  0xef   :  { %4152 = vmatpush3.msra.mxu0 %v4908_v14  ;;  %4155 = vmatprep.mubr.msk.f32.mxu0 %vm4724_vm0, %v4723_v0 }
  0xf0   :  { %4153 = vmatprep.subr.mxu0 %v4723_v0  ;;  %4123 = vmatpush3.msra.mxu1 %v4891_v12 }
  0xf1   :  { %4154 = vmatpush3.msra.mxu0 %v4918_v16  ;;  %4124 = vmatprep.subr.mxu1 %v4723_v0 }
  0xf2   :  { %4183 = vmatprep.subr.mxu0 %v4723_v0  ;;  %4156 = vmatmul.mubr.msk.f32.vlgmr.msra.gmra.mxu0 %vm86_vm2, %v913_v41 }
  0xf3   :  { %4184 = vmatpush3.msk.msra.mxu0 %vm90_vm1, %v4821_v2  ;;  %4125 = vmatpush3.msra.mxu1 %v4899_v13 }
  0xf4   :  { %4185 = vmatprep.subr.mxu0 %v4723_v0  ;;  %4126 = vmatprep.subr.mxu1 %v4723_v0 }
  0xf5   :  { %4186 = vmatpush3.msra.mxu0 %v4831_v4  ;;  %4127 = vmatpush3.msra.mxu1 %v4908_v14 }
  0xf6   :  { %4187 = vmatprep.subr.mxu0 %v4723_v0  ;;  %4128 = vmatprep.subr.mxu1 %v4723_v0 }
  0xf7   :  { %4188 = vmatpush3.msra.mxu0 %v4841_v5  ;;  %4129 = vmatpush3.msra.mxu1 %v4918_v16 }
  0xf8   :  { %4189 = vmatprep.subr.mxu0 %v4723_v0  ;;  %4130 = vmatprep.mubr.msk.f32.mxu1 %vm4724_vm0, %v4723_v0  ;;  %v5181_v43 = vpop.f32.mrf.mxu1 }
  0xf9   :  { %4190 = vmatpush3.msra.mxu0 %v4850_v6  ;;  %4131 = vmatmul.mubr.msk.f32.vlgmr.msra.gmra.mxu1 %vm86_vm2, %v829_v42  ;;  %v161_v18 = vadd.f32 %v5393_v15, %v5181_v43 }
  0xfa   :  { %4158 = vmatprep.subr.mxu1 %v4723_v0  ;;  %4191 = vmatprep.subr.mxu0 %v4723_v0  ;;  %v3907_v44 = vpop.f32.mrf.mxu1 }
  0xfb   :  { %4159 = vmatpush3.msk.msra.mxu1 %vm90_vm1, %v4821_v2  ;;  %4192 = vmatpush3.msra.mxu0 %v4858_v7  ;;  %v164_v23 = vmax.f32 %v161_v18, 0.0 }
  0xfc   :  { %4160 = vmatprep.subr.mxu1 %v4723_v0  ;;  %4193 = vmatprep.subr.mxu0 %v4723_v0 }
  0xfd   :  { %4161 = vmatpush3.msra.mxu1 %v4831_v4  ;;  %4194 = vmatpush3.msra.mxu0 %v4871_v9 }
  0xfe   :  { %4162 = vmatprep.subr.mxu1 %v4723_v0  ;;  %4195 = vmatprep.subr.mxu0 %v4723_v0 }
  0xff   :  { %4163 = vmatpush3.msra.mxu1 %v4841_v5  ;;  %4196 = vmatpush3.msra.mxu0 %v4883_v11 }
 0x100   :  { %4164 = vmatprep.subr.mxu1 %v4723_v0  ;;  %4197 = vmatprep.subr.mxu0 %v4723_v0 }
 0x101   :  { %4165 = vmatpush3.msra.mxu1 %v4850_v6  ;;  %4198 = vmatpush3.msra.mxu0 %v4891_v12 }
 0x102   :  { %4166 = vmatprep.subr.mxu1 %v4723_v0  ;;  %4199 = vmatprep.subr.mxu0 %v4723_v0 }
 0x103   :  { %4167 = vmatpush3.msra.mxu1 %v4858_v7  ;;  %4200 = vmatpush3.msra.mxu0 %v4899_v13 }
 0x104   :  { %4168 = vmatprep.subr.mxu1 %v4723_v0  ;;  %4201 = vmatprep.subr.mxu0 %v4723_v0 }
 0x105   :  { %4169 = vmatpush3.msra.mxu1 %v4871_v9  ;;  %4202 = vmatpush3.msra.mxu0 %v4908_v14 }
 0x106   :  { %4170 = vmatprep.subr.mxu1 %v4723_v0  ;;  %4203 = vmatprep.subr.mxu0 %v4723_v0 }
 0x107   :  { %4171 = vmatpush3.msra.mxu1 %v4883_v11  ;;  %4204 = vmatpush3.msra.mxu0 %v4918_v16 }
 0x108   :  { %4172 = vmatprep.subr.mxu1 %v4723_v0  ;;  %4205 = vmatprep.mubr.msk.f32.mxu0 %vm4724_vm0, %v4723_v0 }
 0x109   :  { %3294 = vmatprep.subr.mxu0 %v5215_v46  ;;  %4173 = vmatpush3.msra.mxu1 %v4891_v12 }
 0x10a   :  { %4206 = vmatmul.mubr.msk.f32.vlgmr.msra.gmra.mxu0 %vm86_vm2, %v1075_v47  ;;  %4174 = vmatprep.subr.mxu1 %v4723_v0 }
 0x10b   :  { %3295 = vmatpush3.msra.mxu0 %v5225_v48  ;;  %4175 = vmatpush3.msra.mxu1 %v4899_v13 }
 0x10c   :  { %3296 = vmatprep.subr.mxu0 %v5232_v49  ;;  %4176 = vmatprep.subr.mxu1 %v4723_v0 }
 0x10d   :  { %3297 = vmatpush3.msra.mxu0 %v5239_v50  ;;  %4177 = vmatpush3.msra.mxu1 %v4908_v14 }
 0x10e   :  { %3298 = vmatprep.subr.mxu0 %v5246_v51  ;;  %4178 = vmatprep.subr.mxu1 %v4723_v0 }
 0x10f   :  { %3299 = vmatpush3.msra.mxu0 %v5253_v53  ;;  %4179 = vmatpush3.msra.mxu1 %v4918_v16 }
 0x110   :  { %3300 = vmatprep.subr.mxu0 %v5260_v54  ;;  %4180 = vmatprep.mubr.msk.f32.mxu1 %vm4724_vm0, %v4723_v0 }
 0x111   :  { %3301 = vmatpush3.msra.mxu0 %v5267_v56  ;;  %4181 = vmatmul.mubr.msk.f32.vlgmr.msra.gmra.mxu1 %vm86_vm2, %v997_v55 }
 0x112   :  { %4208 = vmatprep.subr.mxu1 %v4723_v0  ;;  %3302 = vmatprep.subr.mxu0 %v5274_v57 }
 0x113   :  { %4209 = vmatpush3.msk.msra.mxu1 %vm90_vm1, %v4821_v2  ;;  %3303 = vmatpush3.msra.mxu0 %v5282_v58  ;;  %v5332_v2 = vld [vmem:[%s6507_s3 + $0xb8] sm:$0xff] }
 0x114   :  { %4210 = vmatprep.subr.mxu1 %v4723_v0  ;;  %3304 = vmatprep.subr.mxu0 %v5289_v59 }
 0x115   :  { %4211 = vmatpush3.msra.mxu1 %v4831_v4  ;;  %3305 = vmatpush3.msra.mxu0 %v5296_v60  ;;  %v5346_v4 = vld [vmem:[%s6507_s3 + $0xb0] sm:$0xff] }
 0x116   :  { %4212 = vmatprep.subr.mxu1 %v4723_v0  ;;  %3306 = vmatprep.subr.mxu0 %v5304_v61 }
 0x117   :  { %4213 = vmatpush3.msra.mxu1 %v4841_v5  ;;  %3307 = vmatpush3.msra.mxu0 %v5311_v62  ;;  %v5353_v5 = vld [vmem:[%s6507_s3 + $0x30] sm:$0xff] }
 0x118   :  { %4214 = vmatprep.subr.mxu1 %v4723_v0  ;;  %3308 = vmatprep.subr.mxu0 %v5318_v63 }
 0x119   :  { %4215 = vmatpush3.msra.mxu1 %v4850_v6  ;;  %3309 = vmatpush3.msra.mxu0 %v5325_v1  ;;  %v5360_v6 = vld [vmem:[%s6507_s3 + $0xa8] sm:$0xff] }
 0x11a   :  { %4216 = vmatprep.subr.mxu1 %v4723_v0  ;;  %3310 = vmatprep.subr.mxu0 %v5332_v2 }
 0x11b   :  { %4217 = vmatpush3.msra.mxu1 %v4858_v7  ;;  %3311 = vmatpush3.msra.mxu0 %v5339_v3  ;;  %v5374_v7 = vld [vmem:[%s6507_s3 + $0xa0] sm:$0xff] }
 0x11c   :  { %4218 = vmatprep.subr.mxu1 %v4723_v0  ;;  %3312 = vmatprep.subr.mxu0 %v5346_v4 }
 0x11d   :  { %4219 = vmatpush3.msra.mxu1 %v4871_v9  ;;  %3313 = vmatpush3.msra.mxu0 %v5353_v5  ;;  %v5388_v9 = vld [vmem:[%s6507_s3 + $0x98] sm:$0xff] }
 0x11e   :  { %4220 = vmatprep.subr.mxu1 %v4723_v0  ;;  %3314 = vmatprep.subr.mxu0 %v5360_v6 }
 0x11f   :  { %4221 = vmatpush3.msra.mxu1 %v4883_v11  ;;  %3315 = vmatpush3.msra.mxu0 %v5367_v8  ;;  %v5400_v11 = vld [vmem:[%s6507_s3 + $0x18] sm:$0xff] }
 0x120   :  { %4222 = vmatprep.subr.mxu1 %v4723_v0  ;;  %3316 = vmatprep.subr.mxu0 %v5374_v7 }
 0x121   :  { %4223 = vmatpush3.msra.mxu1 %v4891_v12  ;;  %3317 = vmatpush3.msra.mxu0 %v5381_v10  ;;  %v1157_v12 = vpop.permute.xlu1 %1156 }
 0x122   :  { %4224 = vmatprep.subr.mxu1 %v4723_v0  ;;  %3318 = vmatprep.subr.mxu0 %v5388_v9  ;;  %v1159_v22 = vsel %vm1158_vm11, %v1155_v20, %v1157_v12 }
 0x123   :  { %4225 = vmatpush3.msra.mxu1 %v4899_v13  ;;  %3319 = vmatpush3.msra.mxu0 %v5400_v11  ;;  %v5432_v13 = vld [vmem:[%s6507_s3 + $0x8] sm:$0xff] }
 0x124   :  { %4226 = vmatprep.subr.mxu1 %v4723_v0  ;;  %3320 = vmatprep.subr.mxu0 %v5407_v17 }
 0x125   :  { %4227 = vmatpush3.msra.mxu1 %v4908_v14  ;;  %3321 = vmatpush3.msra.mxu0 %v5416_v19  ;;  %v5447_v14 = vld [vmem:[%s6507_s3] sm:$0xff] }
 0x126   :  { %4228 = vmatprep.subr.mxu1 %v4723_v0  ;;  %3322 = vmatprep.subr.mxu0 %v5423_v21 }
 0x127   :  { %4229 = vmatpush3.msra.mxu1 %v4918_v16  ;;  %4230 = vmatprep.mubr.msk.f32.mxu1 %vm4724_vm0, %v4723_v0  ;;  %v5462_v16 = vld [vmem:[%s6507_s3 + $0x170] sm:$0xff] }
 0x128   :  { %3323 = vmatpush3.msra.mxu0 %v5432_v13  ;;  %4231 = vmatmul.mubr.msk.f32.vlgmr.msra.gmra.mxu1 %vm86_vm2, %v1159_v22 }
 0x129   :  { %3324 = vmatprep.subr.mxu0 %v5439_v24  ;;  %4233 = vmatprep.subr.mxu1 %v4723_v0 }
 0x12a   :  { %3325 = vmatpush3.msra.mxu0 %v5447_v14  ;;  %1356 = vmatprep.mubr.f32.mxu0 %v164_v23 }
 0x12b   :  { %4234 = vmatpush3.msra.mxu1 %v5454_v25  ;;  %3346 = vmatprep.subr.mxu0 %v5215_v46 }
 0x12c   :  { %1357 = vmatmul.mubr.f32.vlgmr.msra.gmra.mxu0 %v4723_v0  ;;  %4235 = vmatprep.subr.mxu1 %v4723_v0 }
 0x12d   :  { %3347 = vmatpush3.msra.mxu0 %v5225_v48  ;;  %4236 = vmatpush3.msra.mxu1 %v5462_v16 }
 0x12e   :  { %3348 = vmatprep.subr.mxu0 %v5232_v49  ;;  %4237 = vmatprep.subr.mxu1 %v4723_v0 }
 0x12f   :  { %3349 = vmatpush3.msra.mxu0 %v5239_v50  ;;  %4238 = vmatpush3.msra.mxu1 %v5471_v26 }
 0x130   :  { %3350 = vmatprep.subr.mxu0 %v5246_v51  ;;  %4239 = vmatprep.subr.mxu1 %v4723_v0 }
 0x131   :  { %3351 = vmatpush3.msra.mxu0 %v5253_v53  ;;  %4240 = vmatpush3.msra.mxu1 %v5480_v27 }
 0x132   :  { %3352 = vmatprep.subr.mxu0 %v5260_v54  ;;  %4241 = vmatprep.subr.mxu1 %v4723_v0 }
 0x133   :  { %3353 = vmatpush3.msra.mxu0 %v5267_v56  ;;  %4242 = vmatpush3.msra.mxu1 %v5489_v28 }
 0x134   :  { %3354 = vmatprep.subr.mxu0 %v5274_v57  ;;  %4243 = vmatprep.subr.mxu1 %v4723_v0 }
 0x135   :  { %3355 = vmatpush3.msra.mxu0 %v5282_v58  ;;  %4244 = vmatpush3.msra.mxu1 %v5498_v29 }
 0x136   :  { %3356 = vmatprep.subr.mxu0 %v5289_v59  ;;  %4245 = vmatprep.subr.mxu1 %v4723_v0 }
 0x137   :  { %3357 = vmatpush3.msra.mxu0 %v5296_v60  ;;  %4246 = vmatpush3.msra.mxu1 %v5507_v30 }
 0x138   :  { %3358 = vmatprep.subr.mxu0 %v5304_v61  ;;  %4247 = vmatprep.subr.mxu1 %v4723_v0 }
 0x139   :  { %3359 = vmatpush3.msra.mxu0 %v5311_v62  ;;  %4248 = vmatpush3.msra.mxu1 %v5516_v31 }
 0x13a   :  { %3360 = vmatprep.subr.mxu0 %v5318_v63  ;;  %4249 = vmatprep.subr.mxu1 %v4723_v0 }
 0x13b   :  { %3361 = vmatpush3.msra.mxu0 %v5325_v1  ;;  %4250 = vmatpush3.msra.mxu1 %v5525_v32 }
 0x13c   :  { %3362 = vmatprep.subr.mxu0 %v5332_v2  ;;  %4251 = vmatprep.subr.mxu1 %v4723_v0 }
 0x13d   :  { %3363 = vmatpush3.msra.mxu0 %v5339_v3  ;;  %4252 = vmatpush3.msra.mxu1 %v5534_v33 }
 0x13e   :  { %3364 = vmatprep.subr.mxu0 %v5346_v4  ;;  %4253 = vmatprep.subr.mxu1 %v4723_v0 }
 0x13f   :  { %3365 = vmatpush3.msra.mxu0 %v5353_v5  ;;  %4254 = vmatpush3.msra.mxu1 %v5543_v34 }
 0x140   :  { %3366 = vmatprep.subr.mxu0 %v5360_v6  ;;  %4255 = vmatprep.subr.mxu1 %v4723_v0 }
 0x141   :  { %3367 = vmatpush3.msra.mxu0 %v5367_v8  ;;  %4256 = vmatpush3.msra.mxu1 %v5552_v35 }
 0x142   :  { %3368 = vmatprep.subr.mxu0 %v5374_v7  ;;  %4257 = vmatprep.subr.mxu1 %v4723_v0 }
 0x143   :  { %3369 = vmatpush3.msra.mxu0 %v5381_v10  ;;  %4258 = vmatpush3.msra.mxu1 %v5561_v36 }
 0x144   :  { %3370 = vmatprep.subr.mxu0 %v5388_v9  ;;  %4259 = vmatprep.subr.mxu1 %v4723_v0 }
 0x145   :  { %3371 = vmatpush3.msra.mxu0 %v5400_v11  ;;  %4260 = vmatpush3.msra.mxu1 %v5570_v37 }
 0x146   :  { %3372 = vmatprep.subr.mxu0 %v5407_v17  ;;  %4261 = vmatprep.subr.mxu1 %v4723_v0 }
 0x147   :  { %3373 = vmatpush3.msra.mxu0 %v5416_v19  ;;  %4262 = vmatpush3.msra.mxu1 %v5579_v38 }
 0x148   :  { %3374 = vmatprep.subr.mxu0 %v5423_v21  ;;  %4263 = vmatprep.subr.mxu1 %v4723_v0 }
 0x149   :  { %3375 = vmatpush3.msra.mxu0 %v5432_v13  ;;  %4264 = vmatpush3.msra.mxu1 %v5588_v39 }
 0x14a   :  { %3376 = vmatprep.subr.mxu0 %v5439_v24  ;;  %4265 = vmatprep.mubr.msk.f32.mxu1 %vm4724_vm0, %v4723_v0 }
 0x14b   :  { %3377 = vmatpush3.msra.mxu0 %v5447_v14  ;;  %4268 = vmatprep.subr.mxu1 %v4723_v0 }
 0x14c   :  { %3398 = vmatprep.subr.mxu0 %v5215_v46 }
 0x156   :  { %v244_v40 = vpop.f32.mrf.mxu1  ;;  %v328_v41 = vpop.f32.mrf.mxu0 }
 0x157   :  { %v245_v42 = vadd.f32 %v5393_v15, %v244_v40  ;;  %v329_v43 = vadd.f32 %v5393_v15, %v328_v41 }
 0x158   :  { %v3932_v44 = vpop.f32.mrf.mxu1  ;;  %v3957_v45 = vpop.f32.mrf.mxu0 }
 0x159   :  { %v248_v47 = vmax.f32 %v245_v42, 0.0  ;;  %v332_v52 = vmax.f32 %v329_v43, 0.0 }
 0x15b   :  { %4266 = vmatmul.mubr.f32.vlgmr.msra.gmra.mxu1 %v248_v47  ;;  %1501 = vmatprep.mubr.f32.mxu0 %v332_v52 }
 0x15c   :  { %4269 = vmatpush3.msra.mxu1 %v5454_v25  ;;  %1502 = vmatmul.mubr.f32.vlgmr.msra.gmra.mxu0 %v248_v47 }
 0x15d   :  { %4270 = vmatprep.subr.mxu1 %v4723_v0  ;;  %3399 = vmatpush3.msra.mxu0 %v5225_v48 }
 0x15e   :  { %4271 = vmatpush3.msra.mxu1 %v5462_v16  ;;  %3400 = vmatprep.subr.mxu0 %v5232_v49 }
 0x15f   :  { %4272 = vmatprep.subr.mxu1 %v4723_v0  ;;  %3401 = vmatpush3.msra.mxu0 %v5239_v50 }
 0x160   :  { %4273 = vmatpush3.msra.mxu1 %v5471_v26  ;;  %3402 = vmatprep.subr.mxu0 %v5246_v51 }
 0x161   :  { %4274 = vmatprep.subr.mxu1 %v4723_v0  ;;  %3403 = vmatpush3.msra.mxu0 %v5253_v53 }
 0x162   :  { %4275 = vmatpush3.msra.mxu1 %v5480_v27  ;;  %3404 = vmatprep.subr.mxu0 %v5260_v54 }
 0x163   :  { %4276 = vmatprep.subr.mxu1 %v4723_v0  ;;  %3405 = vmatpush3.msra.mxu0 %v5267_v56 }
 0x164   :  { %4277 = vmatpush3.msra.mxu1 %v5489_v28  ;;  %3406 = vmatprep.subr.mxu0 %v5274_v57 }
 0x165   :  { %4278 = vmatprep.subr.mxu1 %v4723_v0  ;;  %3407 = vmatpush3.msra.mxu0 %v5282_v58 }
 0x166   :  { %4279 = vmatpush3.msra.mxu1 %v5498_v29  ;;  %3408 = vmatprep.subr.mxu0 %v5289_v59 }
 0x167   :  { %4280 = vmatprep.subr.mxu1 %v4723_v0  ;;  %3409 = vmatpush3.msra.mxu0 %v5296_v60 }
 0x168   :  { %4281 = vmatpush3.msra.mxu1 %v5507_v30  ;;  %3410 = vmatprep.subr.mxu0 %v5304_v61 }
 0x169   :  { %4282 = vmatprep.subr.mxu1 %v4723_v0  ;;  %3411 = vmatpush3.msra.mxu0 %v5311_v62 }
 0x16a   :  { %4283 = vmatpush3.msra.mxu1 %v5516_v31  ;;  %3412 = vmatprep.subr.mxu0 %v5318_v63 }
 0x16b   :  { %4284 = vmatprep.subr.mxu1 %v4723_v0  ;;  %3413 = vmatpush3.msra.mxu0 %v5325_v1 }
 0x16c   :  { %4285 = vmatpush3.msra.mxu1 %v5525_v32  ;;  %3414 = vmatprep.subr.mxu0 %v5332_v2  ;;  %v406_v55 = vpop.f32.mrf.mxu1 }
 0x16d   :  { %4286 = vmatprep.subr.mxu1 %v4723_v0  ;;  %3415 = vmatpush3.msra.mxu0 %v5339_v3  ;;  %v407_v22 = vadd.f32 %v5393_v15, %v406_v55 }
 0x16e   :  { %4287 = vmatpush3.msra.mxu1 %v5534_v33  ;;  %3416 = vmatprep.subr.mxu0 %v5346_v4  ;;  %v490_v18 = vpop.f32.mrf.mxu0  ;;  %v3982_v12 = vpop.f32.mrf.mxu1 }
 0x16f   :  { %4288 = vmatprep.subr.mxu1 %v4723_v0  ;;  %3417 = vmatpush3.msra.mxu0 %v5353_v5  ;;  %v491_v23 = vadd.f32 %v5393_v15, %v490_v18  ;;  %v410_v40 = vmax.f32 %v407_v22, 0.0 }
 0x170   :  { %4289 = vmatpush3.msra.mxu1 %v5543_v34  ;;  %3418 = vmatprep.subr.mxu0 %v5360_v6  ;;  %v4007_v20 = vpop.f32.mrf.mxu0 }
 0x171   :  { %4290 = vmatprep.subr.mxu1 %v4723_v0  ;;  %3419 = vmatpush3.msra.mxu0 %v5367_v8  ;;  %v494_v41 = vmax.f32 %v491_v23, 0.0 }
 0x172   :  { %4291 = vmatpush3.msra.mxu1 %v5552_v35  ;;  %3420 = vmatprep.subr.mxu0 %v5374_v7 }
 0x173   :  { %4292 = vmatprep.subr.mxu1 %v4723_v0  ;;  %3421 = vmatpush3.msra.mxu0 %v5381_v10 }
 0x174   :  { %4293 = vmatpush3.msra.mxu1 %v5561_v36  ;;  %3422 = vmatprep.subr.mxu0 %v5388_v9 }
 0x175   :  { %4294 = vmatprep.subr.mxu1 %v4723_v0  ;;  %3423 = vmatpush3.msra.mxu0 %v5400_v11 }
 0x176   :  { %4295 = vmatpush3.msra.mxu1 %v5570_v37  ;;  %3424 = vmatprep.subr.mxu0 %v5407_v17 }
 0x177   :  { %4296 = vmatprep.subr.mxu1 %v4723_v0  ;;  %3425 = vmatpush3.msra.mxu0 %v5416_v19 }
 0x178   :  { %4297 = vmatpush3.msra.mxu1 %v5579_v38  ;;  %3426 = vmatprep.subr.mxu0 %v5423_v21 }
 0x179   :  { %4298 = vmatprep.subr.mxu1 %v4723_v0  ;;  %3427 = vmatpush3.msra.mxu0 %v5432_v13 }
 0x17a   :  { %4299 = vmatpush3.msra.mxu1 %v5588_v39  ;;  %4300 = vmatprep.mubr.msk.f32.mxu1 %vm4724_vm0, %v4723_v0 }
 0x17b   :  { %3428 = vmatprep.subr.mxu0 %v5439_v24  ;;  %4301 = vmatmul.mubr.f32.vlgmr.msra.gmra.mxu1 %v410_v40 }
 0x17c   :  { %3429 = vmatpush3.msra.mxu0 %v5447_v14  ;;  %1646 = vmatprep.mubr.f32.mxu0 %v494_v41 }
 0x17d   :  { %4303 = vmatprep.subr.mxu1 %v4723_v0  ;;  %1647 = vmatmul.mubr.f32.vlgmr.msra.gmra.mxu0 %v410_v40 }
 0x17e   :  { %4304 = vmatpush3.msra.mxu1 %v5454_v25  ;;  %3450 = vmatprep.subr.mxu0 %v5215_v46 }
 0x17f   :  { %4305 = vmatprep.subr.mxu1 %v4723_v0  ;;  %3451 = vmatpush3.msra.mxu0 %v5225_v48 }
 0x180   :  { %4306 = vmatpush3.msra.mxu1 %v5462_v16  ;;  %3452 = vmatprep.subr.mxu0 %v5232_v49 }
 0x181   :  { %4307 = vmatprep.subr.mxu1 %v4723_v0  ;;  %3453 = vmatpush3.msra.mxu0 %v5239_v50 }
 0x182   :  { %4308 = vmatpush3.msra.mxu1 %v5471_v26  ;;  %3454 = vmatprep.subr.mxu0 %v5246_v51 }
 0x183   :  { %4309 = vmatprep.subr.mxu1 %v4723_v0  ;;  %3455 = vmatpush3.msra.mxu0 %v5253_v53 }
 0x184   :  { %4310 = vmatpush3.msra.mxu1 %v5480_v27  ;;  %3456 = vmatprep.subr.mxu0 %v5260_v54  ;;  %v568_v42 = vpop.f32.mrf.mxu1 }
 0x185   :  { %4311 = vmatprep.subr.mxu1 %v4723_v0  ;;  %3457 = vmatpush3.msra.mxu0 %v5267_v56  ;;  %v569_v47 = vadd.f32 %v5393_v15, %v568_v42 }
 0x186   :  { %4312 = vmatpush3.msra.mxu1 %v5489_v28  ;;  %3458 = vmatprep.subr.mxu0 %v5274_v57  ;;  %v652_v43 = vpop.f32.mrf.mxu0  ;;  %v4032_v44 = vpop.f32.mrf.mxu1 }
 0x187   :  { %4313 = vmatprep.subr.mxu1 %v4723_v0  ;;  %3459 = vmatpush3.msra.mxu0 %v5282_v58  ;;  %v653_v52 = vadd.f32 %v5393_v15, %v652_v43  ;;  %v572_v55 = vmax.f32 %v569_v47, 0.0 }
 0x188   :  { %4314 = vmatpush3.msra.mxu1 %v5498_v29  ;;  %3460 = vmatprep.subr.mxu0 %v5289_v59  ;;  %v4057_v45 = vpop.f32.mrf.mxu0 }
 0x189   :  { %4315 = vmatprep.subr.mxu1 %v4723_v0  ;;  %3461 = vmatpush3.msra.mxu0 %v5296_v60  ;;  %v656_v18 = vmax.f32 %v653_v52, 0.0 }
 0x18a   :  { %4316 = vmatpush3.msra.mxu1 %v5507_v30  ;;  %3462 = vmatprep.subr.mxu0 %v5304_v61 }
 0x18b   :  { %4317 = vmatprep.subr.mxu1 %v4723_v0  ;;  %3463 = vmatpush3.msra.mxu0 %v5311_v62 }
 0x18c   :  { %4318 = vmatpush3.msra.mxu1 %v5516_v31  ;;  %3464 = vmatprep.subr.mxu0 %v5318_v63 }
 0x18d   :  { %4319 = vmatprep.subr.mxu1 %v4723_v0  ;;  %3465 = vmatpush3.msra.mxu0 %v5325_v1 }
 0x18e   :  { %4320 = vmatpush3.msra.mxu1 %v5525_v32  ;;  %3466 = vmatprep.subr.mxu0 %v5332_v2 }
 0x18f   :  { %4321 = vmatprep.subr.mxu1 %v4723_v0  ;;  %3467 = vmatpush3.msra.mxu0 %v5339_v3 }
 0x190   :  { %4322 = vmatpush3.msra.mxu1 %v5534_v33  ;;  %3468 = vmatprep.subr.mxu0 %v5346_v4 }
 0x191   :  { %4323 = vmatprep.subr.mxu1 %v4723_v0  ;;  %3469 = vmatpush3.msra.mxu0 %v5353_v5 }
 0x192   :  { %4324 = vmatpush3.msra.mxu1 %v5543_v34  ;;  %3470 = vmatprep.subr.mxu0 %v5360_v6 }
 0x193   :  { %4325 = vmatprep.subr.mxu1 %v4723_v0  ;;  %3471 = vmatpush3.msra.mxu0 %v5367_v8 }
 0x194   :  { %4326 = vmatpush3.msra.mxu1 %v5552_v35  ;;  %3472 = vmatprep.subr.mxu0 %v5374_v7 }
 0x195   :  { %4327 = vmatprep.subr.mxu1 %v4723_v0  ;;  %3473 = vmatpush3.msra.mxu0 %v5381_v10 }
 0x196   :  { %4328 = vmatpush3.msra.mxu1 %v5561_v36  ;;  %3474 = vmatprep.subr.mxu0 %v5388_v9 }
 0x197   :  { %4329 = vmatprep.subr.mxu1 %v4723_v0  ;;  %3475 = vmatpush3.msra.mxu0 %v5400_v11 }
 0x198   :  { %4330 = vmatpush3.msra.mxu1 %v5570_v37  ;;  %3476 = vmatprep.subr.mxu0 %v5407_v17 }
 0x199   :  { %4331 = vmatprep.subr.mxu1 %v4723_v0  ;;  %3477 = vmatpush3.msra.mxu0 %v5416_v19 }
 0x19a   :  { %4332 = vmatpush3.msra.mxu1 %v5579_v38  ;;  %3478 = vmatprep.subr.mxu0 %v5423_v21 }
 0x19b   :  { %4333 = vmatprep.subr.mxu1 %v4723_v0  ;;  %3479 = vmatpush3.msra.mxu0 %v5432_v13 }
 0x19c   :  { %4334 = vmatpush3.msra.mxu1 %v5588_v39  ;;  %4335 = vmatprep.mubr.msk.f32.mxu1 %vm4724_vm0, %v4723_v0  ;;  %v5736_v12 = vpop.f32.mrf.mxu0 }
 0x19d   :  { %3480 = vmatprep.subr.mxu0 %v5439_v24  ;;  %4336 = vmatmul.mubr.f32.vlgmr.msra.gmra.mxu1 %v572_v55  ;;  %v815_v43 = vadd.f32 %v5393_v15, %v5736_v12 }
 0x19e   :  { %3481 = vmatpush3.msra.mxu0 %v5447_v14  ;;  %1791 = vmatprep.mubr.f32.mxu0 %v656_v18  ;;  %v4107_v20 = vpop.f32.mrf.mxu0 }
 0x19f   :  { %4338 = vmatprep.subr.mxu1 %v4723_v0  ;;  %1792 = vmatmul.mubr.f32.vlgmr.msra.gmra.mxu0 %v572_v55  ;;  %v730_v22 = vpop.f32.mrf.mxu1  ;;  %v818_v52 = vmax.f32 %v815_v43, 0.0 }
 0x1a0   :  { %4339 = vmatpush3.msra.mxu1 %v5454_v25  ;;  %3502 = vmatprep.subr.mxu0 %v5215_v46  ;;  %v731_v42 = vadd.f32 %v5393_v15, %v730_v22 }
 0x1a1   :  { %4340 = vmatprep.subr.mxu1 %v4723_v0  ;;  %3503 = vmatpush3.msra.mxu0 %v5225_v48  ;;  %v4082_v23 = vpop.f32.mrf.mxu1 }
 0x1a2   :  { %4341 = vmatpush3.msra.mxu1 %v5462_v16  ;;  %3504 = vmatprep.subr.mxu0 %v5232_v49  ;;  %v734_v45 = vmax.f32 %v731_v42, 0.0  ;;  %v4671_v23 = vld [vmem:[%s6507_s3 + $0xf8] sm:$0xff] }
 0x1a3   :  { %4342 = vmatprep.subr.mxu1 %v4723_v0  ;;  %3505 = vmatpush3.msra.mxu0 %v5239_v50 }
 0x1a4   :  { %4343 = vmatpush3.msra.mxu1 %v5471_v26  ;;  %3506 = vmatprep.subr.mxu0 %v5246_v51 }
 0x1a5   :  { %4344 = vmatprep.subr.mxu1 %v4723_v0  ;;  %3507 = vmatpush3.msra.mxu0 %v5253_v53 }
 0x1a6   :  { %4345 = vmatpush3.msra.mxu1 %v5480_v27  ;;  %3508 = vmatprep.subr.mxu0 %v5260_v54 }
 0x1a7   :  { %4346 = vmatprep.subr.mxu1 %v4723_v0  ;;  %3509 = vmatpush3.msra.mxu0 %v5267_v56 }
 0x1a8   :  { %4347 = vmatpush3.msra.mxu1 %v5489_v28  ;;  %3510 = vmatprep.subr.mxu0 %v5274_v57 }
 0x1a9   :  { %4348 = vmatprep.subr.mxu1 %v4723_v0  ;;  %3511 = vmatpush3.msra.mxu0 %v5282_v58 }
 0x1aa   :  { %4349 = vmatpush3.msra.mxu1 %v5498_v29  ;;  %3512 = vmatprep.subr.mxu0 %v5289_v59 }
 0x1ab   :  { %4350 = vmatprep.subr.mxu1 %v4723_v0  ;;  %3513 = vmatpush3.msra.mxu0 %v5296_v60 }
 0x1ac   :  { %4351 = vmatpush3.msra.mxu1 %v5507_v30  ;;  %3514 = vmatprep.subr.mxu0 %v5304_v61 }
 0x1ad   :  { %4352 = vmatprep.subr.mxu1 %v4723_v0  ;;  %3515 = vmatpush3.msra.mxu0 %v5311_v62 }
 0x1ae   :  { %4353 = vmatpush3.msra.mxu1 %v5516_v31  ;;  %3516 = vmatprep.subr.mxu0 %v5318_v63 }
 0x1af   :  { %4354 = vmatprep.subr.mxu1 %v4723_v0  ;;  %3517 = vmatpush3.msra.mxu0 %v5325_v1 }
 0x1b0   :  { %4355 = vmatpush3.msra.mxu1 %v5525_v32  ;;  %3518 = vmatprep.subr.mxu0 %v5332_v2 }
 0x1b1   :  { %4356 = vmatprep.subr.mxu1 %v4723_v0  ;;  %3519 = vmatpush3.msra.mxu0 %v5339_v3 }
 0x1b2   :  { %4357 = vmatpush3.msra.mxu1 %v5534_v33  ;;  %3520 = vmatprep.subr.mxu0 %v5346_v4  ;;  %v5779_v40 = vpop.f32.mrf.mxu0 }
 0x1b3   :  { %4358 = vmatprep.subr.mxu1 %v4723_v0  ;;  %3521 = vmatpush3.msra.mxu0 %v5353_v5  ;;  %v983_v18 = vadd.f32 %v5393_v15, %v5779_v40  ;;  %v4672_v40 = vld [vmem:[%s6507_s3 + $0x78] sm:$0xff] }
 0x1b4   :  { %4359 = vmatpush3.msra.mxu1 %v5543_v34  ;;  %3522 = vmatprep.subr.mxu0 %v5360_v6  ;;  %v4157_v41 = vpop.f32.mrf.mxu0 }
 0x1b5   :  { %4360 = vmatprep.subr.mxu1 %v4723_v0  ;;  %3523 = vmatpush3.msra.mxu0 %v5367_v8  ;;  %v986_v20 = vmax.f32 %v983_v18, 0.0  ;;  %v4673_v41 = vld [vmem:[%s6507_s3 + $0xf0] sm:$0xff] }
 0x1b6   :  { %4361 = vmatpush3.msra.mxu1 %v5552_v35  ;;  %3524 = vmatprep.subr.mxu0 %v5374_v7 }
 0x1b7   :  { %4362 = vmatprep.subr.mxu1 %v4723_v0  ;;  %3525 = vmatpush3.msra.mxu0 %v5381_v10 }
 0x1b8   :  { %4363 = vmatpush3.msra.mxu1 %v5561_v36  ;;  %3526 = vmatprep.subr.mxu0 %v5388_v9 }
 0x1b9   :  { %4364 = vmatprep.subr.mxu1 %v4723_v0  ;;  %3527 = vmatpush3.msra.mxu0 %v5400_v11  ;;  %v5798_v44 = vpop.f32.mrf.mxu1 }
 0x1ba   :  { %4365 = vmatpush3.msra.mxu1 %v5570_v37  ;;  %3528 = vmatprep.subr.mxu0 %v5407_v17  ;;  %v899_v12 = vadd.f32 %v5393_v15, %v5798_v44  ;;  %v6230_v44 = vld [vmem:[%s6509_s5 + $0x158] sm:$0xff] }
 0x1bb   :  { %4366 = vmatprep.subr.mxu1 %v4723_v0  ;;  %3529 = vmatpush3.msra.mxu0 %v5416_v19  ;;  %v4132_v47 = vpop.f32.mrf.mxu1 }
 0x1bc   :  { %4367 = vmatpush3.msra.mxu1 %v5579_v38  ;;  %3530 = vmatprep.subr.mxu0 %v5423_v21  ;;  %v902_v22 = vmax.f32 %v899_v12, 0.0  ;;  %v6237_v47 = vld [vmem:[%s6509_s5 + $0x150] sm:$0xff]  ;;  %v6264_v12 = vld [vmem:[%s6508_s4] ss:$0 sm:$0xff] }
 0x1bd   :  { %4368 = vmatprep.subr.mxu1 %v4723_v0  ;;  %3531 = vmatpush3.msra.mxu0 %v5432_v13 }
 0x1be   :  { %4369 = vmatpush3.msra.mxu1 %v5588_v39  ;;  %4370 = vmatprep.mubr.msk.f32.mxu1 %vm4724_vm0, %v4723_v0 }
 0x1bf   :  { %3532 = vmatprep.subr.mxu0 %v5439_v24  ;;  %4371 = vmatmul.mubr.f32.vlgmr.msra.gmra.mxu1 %v734_v45 }
 0x1c0   :  { %3533 = vmatpush3.msra.mxu0 %v5447_v14  ;;  %1936 = vmatprep.mubr.f32.mxu0 %v818_v52 }
 0x1c1   :  { %4373 = vmatprep.subr.mxu1 %v4723_v0  ;;  %1937 = vmatmul.mubr.f32.vlgmr.msra.gmra.mxu0 %v734_v45 }
 0x1c2   :  { %4374 = vmatpush3.msra.mxu1 %v5454_v25  ;;  %3554 = vmatprep.subr.mxu0 %v5215_v46 }
 0x1c3   :  { %4375 = vmatprep.subr.mxu1 %v4723_v0  ;;  %3555 = vmatpush3.msra.mxu0 %v5225_v48 }
 0x1c4   :  { %4376 = vmatpush3.msra.mxu1 %v5462_v16  ;;  %3556 = vmatprep.subr.mxu0 %v5232_v49 }
 0x1c5   :  { %4377 = vmatprep.subr.mxu1 %v4723_v0  ;;  %3557 = vmatpush3.msra.mxu0 %v5239_v50 }
 0x1c6   :  { %4378 = vmatpush3.msra.mxu1 %v5471_v26  ;;  %3558 = vmatprep.subr.mxu0 %v5246_v51 }
 0x1c7   :  { %4379 = vmatprep.subr.mxu1 %v4723_v0  ;;  %3559 = vmatpush3.msra.mxu0 %v5253_v53 }
 0x1c8   :  { %4380 = vmatpush3.msra.mxu1 %v5480_v27  ;;  %3560 = vmatprep.subr.mxu0 %v5260_v54 }
 0x1c9   :  { %4381 = vmatprep.subr.mxu1 %v4723_v0  ;;  %3561 = vmatpush3.msra.mxu0 %v5267_v56 }
 0x1ca   :  { %4382 = vmatpush3.msra.mxu1 %v5489_v28  ;;  %3562 = vmatprep.subr.mxu0 %v5274_v57  ;;  %v5832_v46 = vpop.f32.mrf.mxu0 }
 0x1cb   :  { %4383 = vmatprep.subr.mxu1 %v4723_v0  ;;  %3563 = vmatpush3.msra.mxu0 %v5282_v58 }
 0x1cc   :  { %4384 = vmatpush3.msra.mxu1 %v5498_v29  ;;  %3564 = vmatprep.subr.mxu0 %v5289_v59  ;;  %v4207_v48 = vpop.f32.mrf.mxu0 }
 0x1cd   :  { %4385 = vmatprep.subr.mxu1 %v4723_v0  ;;  %3565 = vmatpush3.msra.mxu0 %v5296_v60  ;;  %v6251_v48 = vld [vmem:[%s6509_s5 + $0x140] sm:$0xff] }
 0x1ce   :  { %4386 = vmatpush3.msra.mxu1 %v5507_v30  ;;  %3566 = vmatprep.subr.mxu0 %v5304_v61 }
 0x1cf   :  { %4387 = vmatprep.subr.mxu1 %v4723_v0  ;;  %3567 = vmatpush3.msra.mxu0 %v5311_v62 }
 0x1d0   :  { %4388 = vmatpush3.msra.mxu1 %v5516_v31  ;;  %3568 = vmatprep.subr.mxu0 %v5318_v63 }
 0x1d1   :  { %4389 = vmatprep.subr.mxu1 %v4723_v0  ;;  %3569 = vmatpush3.msra.mxu0 %v5325_v1  ;;  %v5848_v49 = vpop.f32.mrf.mxu1 }
 0x1d2   :  { %4390 = vmatpush3.msra.mxu1 %v5525_v32  ;;  %3570 = vmatprep.subr.mxu0 %v5332_v2 }
 0x1d3   :  { %4391 = vmatprep.subr.mxu1 %v4723_v0  ;;  %3571 = vmatpush3.msra.mxu0 %v5339_v3  ;;  %v4182_v55 = vpop.f32.mrf.mxu1 }
 0x1d4   :  { %4392 = vmatpush3.msra.mxu1 %v5534_v33  ;;  %3572 = vmatprep.subr.mxu0 %v5346_v4  ;;  %v6258_v55 = vld [vmem:[%s6509_s5 + $0x138] sm:$0xff] }
 0x1d5   :  { %4393 = vmatprep.subr.mxu1 %v4723_v0  ;;  %3573 = vmatpush3.msra.mxu0 %v5353_v5 }
 0x1d6   :  { %4394 = vmatpush3.msra.mxu1 %v5543_v34  ;;  %3574 = vmatprep.subr.mxu0 %v5360_v6 }
 0x1d7   :  { %4395 = vmatprep.subr.mxu1 %v4723_v0  ;;  %3575 = vmatpush3.msra.mxu0 %v5367_v8 }
 0x1d8   :  { %4396 = vmatpush3.msra.mxu1 %v5552_v35  ;;  %3576 = vmatprep.subr.mxu0 %v5374_v7 }
 0x1d9   :  { %4397 = vmatprep.subr.mxu1 %v4723_v0  ;;  %3577 = vmatpush3.msra.mxu0 %v5381_v10 }
 0x1da   :  { %4398 = vmatpush3.msra.mxu1 %v5561_v36  ;;  %3578 = vmatprep.subr.mxu0 %v5388_v9 }
 0x1db   :  { %4399 = vmatprep.subr.mxu1 %v4723_v0  ;;  %3579 = vmatpush3.msra.mxu0 %v5400_v11 }
 0x1dc   :  { %4400 = vmatpush3.msra.mxu1 %v5570_v37  ;;  %3580 = vmatprep.subr.mxu0 %v5407_v17 }
 0x1dd   :  { %4401 = vmatprep.subr.mxu1 %v4723_v0  ;;  %3581 = vmatpush3.msra.mxu0 %v5416_v19 }
 0x1de   :  { %4402 = vmatpush3.msra.mxu1 %v5579_v38  ;;  %3582 = vmatprep.subr.mxu0 %v5423_v21 }
 0x1df   :  { %4403 = vmatprep.subr.mxu1 %v4723_v0  ;;  %3583 = vmatpush3.msra.mxu0 %v5432_v13 }
 0x1e0   :  { %4404 = vmatpush3.msra.mxu1 %v5588_v39  ;;  %4405 = vmatprep.mubr.msk.f32.mxu1 %vm4724_vm0, %v4723_v0 }
 0x1e1   :  { %3584 = vmatprep.subr.mxu0 %v5439_v24  ;;  %4406 = vmatmul.mubr.f32.vlgmr.msra.gmra.mxu1 %v902_v22 }
 0x1e2   :  { %3585 = vmatpush3.msra.mxu0 %v5447_v14  ;;  %2081 = vmatprep.mubr.f32.mxu0 %v986_v20 }
 0x1e3   :  { %4408 = vmatprep.subr.mxu1 %v4723_v0  ;;  %2082 = vmatmul.mubr.f32.vlgmr.msra.gmra.mxu0 %v902_v22  ;;  %v6270_v22 = vld [vmem:[%s6509_s5 + $0x130] sm:$0xff] }
 0x1e4   :  { %4409 = vmatpush3.msra.mxu1 %v5454_v25  ;;  %3606 = vmatprep.subr.mxu0 %v4671_v23  ;;  %v6277_v23 = vld [vmem:[%s6509_s5 + $0x128] sm:$0xff] }
 0x1e5   :  { %4410 = vmatprep.subr.mxu1 %v4723_v0  ;;  %3607 = vmatpush3.msra.mxu0 %v4672_v40 }
 0x1e6   :  { %4411 = vmatpush3.msra.mxu1 %v5462_v16  ;;  %3608 = vmatprep.subr.mxu0 %v4673_v41 }
 0x1e7   :  { %4412 = vmatprep.subr.mxu1 %v4723_v0  ;;  %3609 = vmatpush3.msra.mxu0 %v5239_v50  ;;  %v1145_v50 = vadd.f32 %v5393_v15, %v5832_v46  ;;  %v6244_v46 = vld [vmem:[%s6509_s5 + $0x148] sm:$0xff] }
 0x1e8   :  { %4413 = vmatpush3.msra.mxu1 %v5471_v26  ;;  %3610 = vmatprep.subr.mxu0 %v5246_v51  ;;  %v5904_v42 = vpop.f32.mrf.mxu1  ;;  %v1067_v51 = vadd.f32 %v5393_v15, %v5848_v49  ;;  %v6094_v15 = vld [vmem:[%s6509_s5 + $0xb0] sm:$0xff] }
 0x1e9   :  { %4414 = vmatprep.subr.mxu1 %v4723_v0  ;;  %3611 = vmatpush3.msra.mxu0 %v5253_v53  ;;  %v1148_v53 = vmax.f32 %v1145_v50, 0.0 }
 0x1ea   :  { %4415 = vmatpush3.msra.mxu1 %v5480_v27  ;;  %3612 = vmatprep.subr.mxu0 %v5260_v54  ;;  %v4232_v43 = vpop.f32.mrf.mxu1  ;;  %v1070_v54 = vmax.f32 %v1067_v51, 0.0 }
 0x1eb   :  { %4416 = vmatprep.subr.mxu1 %v4723_v0  ;;  %3613 = vmatpush3.msra.mxu0 %v5267_v56  ;;  %v5968_v56 = vld [vmem:[%s6509_s5 + $0xf8] sm:$0xff] }
 0x1ec   :  { %4417 = vmatpush3.msra.mxu1 %v5489_v28  ;;  %3614 = vmatprep.subr.mxu0 %v5274_v57  ;;  %v5974_v57 = vld [vmem:[%s6509_s5 + $0x78] sm:$0xff] }
 0x1ed   :  { %4418 = vmatprep.subr.mxu1 %v4723_v0  ;;  %3615 = vmatpush3.msra.mxu0 %v5282_v58  ;;  %v5982_v58 = vld [vmem:[%s6509_s5 + $0xf0] sm:$0xff] }
 0x1ee   :  { %4419 = vmatpush3.msra.mxu1 %v5498_v29  ;;  %3616 = vmatprep.subr.mxu0 %v5289_v59  ;;  %v5989_v59 = vld [vmem:[%s6509_s5 + $0x70] sm:$0xff] }
 0x1ef   :  { %4420 = vmatprep.subr.mxu1 %v4723_v0  ;;  %3617 = vmatpush3.msra.mxu0 %v5296_v60  ;;  %v5996_v60 = vld [vmem:[%s6509_s5 + $0xe8] sm:$0xff] }
 0x1f0   :  { %4421 = vmatpush3.msra.mxu1 %v5507_v30  ;;  %3618 = vmatprep.subr.mxu0 %v5304_v61  ;;  %v6003_v61 = vld [vmem:[%s6509_s5 + $0x68] sm:$0xff] }
 0x1f1   :  { %4422 = vmatprep.subr.mxu1 %v4723_v0  ;;  %3619 = vmatpush3.msra.mxu0 %v5311_v62  ;;  %v6010_v62 = vld [vmem:[%s6509_s5 + $0xe0] sm:$0xff] }
 0x1f2   :  { %4423 = vmatpush3.msra.mxu1 %v5516_v31  ;;  %3620 = vmatprep.subr.mxu0 %v5318_v63  ;;  %v6017_v63 = vld [vmem:[%s6509_s5 + $0x60] sm:$0xff] }
 0x1f3   :  { %4424 = vmatprep.subr.mxu1 %v4723_v0  ;;  %3621 = vmatpush3.msra.mxu0 %v5325_v1  ;;  %v6024_v1 = vld [vmem:[%s6509_s5 + $0xd8] sm:$0xff] }
 0x1f4   :  { %4425 = vmatpush3.msra.mxu1 %v5525_v32  ;;  %3622 = vmatprep.subr.mxu0 %v5332_v2  ;;  %v6031_v2 = vld [vmem:[%s6509_s5 + $0x58] sm:$0xff] }
 0x1f5   :  { %4426 = vmatprep.subr.mxu1 %v4723_v0  ;;  %3623 = vmatpush3.msra.mxu0 %v5339_v3  ;;  %v6038_v3 = vld [vmem:[%s6509_s5 + $0xd0] sm:$0xff] }
 0x1f6   :  { %4427 = vmatpush3.msra.mxu1 %v5534_v33  ;;  %3624 = vmatprep.subr.mxu0 %v5346_v4  ;;  %v6045_v4 = vld [vmem:[%s6509_s5 + $0x50] sm:$0xff] }
 0x1f7   :  { %4428 = vmatprep.subr.mxu1 %v4723_v0  ;;  %3625 = vmatpush3.msra.mxu0 %v5353_v5  ;;  %v6052_v5 = vld [vmem:[%s6509_s5 + $0xc8] sm:$0xff] }
 0x1f8   :  { %4429 = vmatpush3.msra.mxu1 %v5543_v34  ;;  %3626 = vmatprep.subr.mxu0 %v5360_v6  ;;  %v6059_v6 = vld [vmem:[%s6509_s5 + $0x48] sm:$0xff] }
 0x1f9   :  { %4430 = vmatprep.subr.mxu1 %v4723_v0  ;;  %3627 = vmatpush3.msra.mxu0 %v5367_v8  ;;  %v6066_v8 = vld [vmem:[%s6509_s5 + $0xc0] sm:$0xff] }
 0x1fa   :  { %4431 = vmatpush3.msra.mxu1 %v5552_v35  ;;  %3628 = vmatprep.subr.mxu0 %v5374_v7  ;;  %v6073_v7 = vld [vmem:[%s6509_s5 + $0x40] sm:$0xff] }
 0x1fb   :  { %4432 = vmatprep.subr.mxu1 %v4723_v0  ;;  %3629 = vmatpush3.msra.mxu0 %v5381_v10  ;;  %v6080_v10 = vld [vmem:[%s6509_s5 + $0xb8] sm:$0xff] }
 0x1fc   :  { %4433 = vmatpush3.msra.mxu1 %v5561_v36  ;;  %3630 = vmatprep.subr.mxu0 %v5388_v9  ;;  %v6087_v9 = vld [vmem:[%s6509_s5 + $0x38] sm:$0xff] }
 0x1fd   :  { %4434 = vmatprep.subr.mxu1 %v4723_v0  ;;  %3631 = vmatpush3.msra.mxu0 %v5400_v11  ;;  %v6101_v11 = vld [vmem:[%s6509_s5 + $0x30] sm:$0xff] }
 0x1fe   :  { %4435 = vmatpush3.msra.mxu1 %v5570_v37  ;;  %3632 = vmatprep.subr.mxu0 %v5407_v17  ;;  %v6108_v17 = vld [vmem:[%s6509_s5 + $0xa8] sm:$0xff] }
 0x1ff   :  { %4436 = vmatprep.subr.mxu1 %v4723_v0  ;;  %3633 = vmatpush3.msra.mxu0 %v5416_v19  ;;  %v6115_v19 = vld [vmem:[%s6509_s5 + $0x28] sm:$0xff] }
 0x200   :  { %4437 = vmatpush3.msra.mxu1 %v5579_v38  ;;  %3634 = vmatprep.subr.mxu0 %v5423_v21  ;;  %v6122_v21 = vld [vmem:[%s6509_s5 + $0xa0] sm:$0xff] }
 0x201   :  { %4438 = vmatprep.subr.mxu1 %v4723_v0  ;;  %3635 = vmatpush3.msra.mxu0 %v5432_v13 }
 0x202   :  { %4439 = vmatpush3.msra.mxu1 %v5588_v39  ;;  %4440 = vmatprep.mubr.msk.f32.mxu1 %vm4724_vm0, %v4723_v0 }
 0x203   :  { %3636 = vmatprep.subr.mxu0 %v5439_v24  ;;  %4441 = vmatmul.mubr.f32.vlgmr.msra.gmra.mxu1 %v1070_v54  ;;  %v6131_v24 = vld [vmem:[%s6509_s5 + $0x20] sm:$0xff] }
 0x204   :  { %3637 = vmatpush3.msra.mxu0 %v5447_v14  ;;  %2226 = vmatprep.mubr.f32.mxu0 %v1148_v53  ;;  %v6138_v14 = vld [vmem:[%s6509_s5 + $0x98] sm:$0xff] }
 0x205   :  { %4443 = vmatprep.subr.mxu1 %v4723_v0  ;;  %2227 = vmatmul.mubr.f32.vlgmr.msra.gmra.mxu0 %v1070_v54  ;;  %v6294_v53 = vld [vmem:[%s6509_s5 + $0x118] sm:$0xff] }
 0x206   :  { %4444 = vmatpush3.msra.mxu1 %v5454_v25  ;;  %4475 = vmatprep.mubr.msk.f32.mxu1 %vm4724_vm0, %v4723_v0 }
 0x207   :  { %4445 = vmatprep.subr.mxu1 %v4723_v0  ;;  %3658 = vmatprep.subr.mxu0 %v5968_v56 }
 0x208   :  { %4446 = vmatpush3.msra.mxu1 %v5462_v16  ;;  %3659 = vmatpush3.msra.mxu0 %v5974_v57  ;;  %v6145_v16 = vld [vmem:[%s6509_s5 + $0x18] sm:$0xff] }
 0x209   :  { %4447 = vmatprep.subr.mxu1 %v4723_v0  ;;  %3660 = vmatprep.subr.mxu0 %v5982_v58 }
 0x20a   :  { %4448 = vmatpush3.msra.mxu1 %v5471_v26  ;;  %3661 = vmatpush3.msra.mxu0 %v5989_v59  ;;  %v6152_v26 = vld [vmem:[%s6509_s5 + $0x90] sm:$0xff] }
 0x20b   :  { %4449 = vmatprep.subr.mxu1 %v4723_v0  ;;  %3662 = vmatprep.subr.mxu0 %v5996_v60 }
 0x20c   :  { %4450 = vmatpush3.msra.mxu1 %v5480_v27  ;;  %3663 = vmatpush3.msra.mxu0 %v6003_v61  ;;  %v4674_v27 = vld [vmem:[%s6506_s2] ss:$0 sm:$0xff] }
 0x20d   :  { %4451 = vmatprep.subr.mxu1 %v4723_v0  ;;  %3664 = vmatprep.subr.mxu0 %v6010_v62 }
 0x20e   :  { %4452 = vmatpush3.msra.mxu1 %v5489_v28  ;;  %3665 = vmatpush3.msra.mxu0 %v6017_v63  ;;  %v1229_v28 = vadd.f32 %v4674_v27, %v5904_v42  ;;  %v6286_v42 = vld [vmem:[%s6509_s5 + $0x120] sm:$0xff] }
 0x20f   :  { %4453 = vmatprep.subr.mxu1 %v4723_v0  ;;  %3666 = vmatprep.subr.mxu0 %v6024_v1 }
 0x210   :  { %4454 = vmatpush3.msra.mxu1 %v5498_v29  ;;  %3667 = vmatpush3.msra.mxu0 %v6031_v2  ;;  %v6163_v29 = vld [vmem:[%s6509_s5 + $0x10] sm:$0xff] }
 0x211   :  { %4455 = vmatprep.subr.mxu1 %v4723_v0  ;;  %3668 = vmatprep.subr.mxu0 %v6038_v3 }
 0x212   :  { %4456 = vmatpush3.msra.mxu1 %v5507_v30  ;;  %3669 = vmatpush3.msra.mxu0 %v6045_v4  ;;  %v6170_v30 = vld [vmem:[%s6509_s5 + $0x88] sm:$0xff] }
 0x213   :  { %4457 = vmatprep.subr.mxu1 %v4723_v0  ;;  %3670 = vmatprep.subr.mxu0 %v6052_v5 }
 0x214   :  { %4458 = vmatpush3.msra.mxu1 %v5516_v31  ;;  %3671 = vmatpush3.msra.mxu0 %v6059_v6  ;;  %v6177_v31 = vld [vmem:[%s6509_s5 + $0x8] sm:$0xff] }
 0x215   :  { %4459 = vmatprep.subr.mxu1 %v4723_v0  ;;  %3672 = vmatprep.subr.mxu0 %v6066_v8 }
 0x216   :  { %4460 = vmatpush3.msra.mxu1 %v5525_v32  ;;  %3673 = vmatpush3.msra.mxu0 %v6073_v7  ;;  %v6184_v32 = vld [vmem:[%s6509_s5 + $0x80] sm:$0xff] }
 0x217   :  { %4461 = vmatprep.subr.mxu1 %v4723_v0  ;;  %3674 = vmatprep.subr.mxu0 %v6080_v10 }
 0x218   :  { %4462 = vmatpush3.msra.mxu1 %v5534_v33  ;;  %3675 = vmatpush3.msra.mxu0 %v6087_v9  ;;  %v1232_v33 = vmax.f32 %v1229_v28, 0.0  ;;  %v6308_v28 = vld [vmem:[%s6509_s5 + $0x108] sm:$0xff] }
 0x219   :  { %4463 = vmatprep.subr.mxu1 %v4723_v0  ;;  %3676 = vmatprep.subr.mxu0 %v6094_v15 }
 0x21a   :  { %4464 = vmatpush3.msra.mxu1 %v5543_v34  ;;  %3677 = vmatpush3.msra.mxu0 %v6101_v11  ;;  %v6191_v34 = vld [vmem:[%s6509_s5] sm:$0xff] }
 0x21b   :  { %4465 = vmatprep.subr.mxu1 %v4723_v0  ;;  %v6125_v13 = vpop.f32.mrf.mxu1  ;;  %3678 = vmatprep.subr.mxu0 %v6108_v17 }
 0x21c   :  { %4466 = vmatpush3.msra.mxu1 %v5552_v35  ;;  %3679 = vmatpush3.msra.mxu0 %v6115_v19  ;;  %v6198_v35 = vld [vmem:[%s6509_s5 + $0x178] sm:$0xff] }
 0x21d   :  { %4467 = vmatprep.subr.mxu1 %v4723_v0  ;;  %v4267_v25 = vpop.f32.mrf.mxu1  ;;  %3680 = vmatprep.subr.mxu0 %v6122_v21 }
 0x21e   :  { %4468 = vmatpush3.msra.mxu1 %v5561_v36  ;;  %3681 = vmatpush3.msra.mxu0 %v6131_v24  ;;  %v6206_v36 = vld [vmem:[%s6509_s5 + $0x170] sm:$0xff] }
 0x21f   :  { %4469 = vmatprep.subr.mxu1 %v4723_v0  ;;  %3682 = vmatprep.subr.mxu0 %v6138_v14 }
 0x220   :  { %4470 = vmatpush3.msra.mxu1 %v5570_v37  ;;  %3683 = vmatpush3.msra.mxu0 %v6145_v16  ;;  %v6215_v37 = vld [vmem:[%s6509_s5 + $0x168] sm:$0xff] }
 0x221   :  { %4471 = vmatprep.subr.mxu1 %v4723_v0  ;;  %3684 = vmatprep.subr.mxu0 %v6152_v26 }
 0x222   :  { %4472 = vmatpush3.msra.mxu1 %v5579_v38  ;;  %3685 = vmatpush3.msra.mxu0 %v6163_v29  ;;  %v3326_v38 = vpop.f32.mrf.mxu0 }
 0x223   :  { %4473 = vmatprep.subr.mxu1 %v4723_v0  ;;  %3686 = vmatprep.subr.mxu0 %v6170_v30 }
 0x224   :  { %4474 = vmatpush3.msra.mxu1 %v5588_v39  ;;  %3687 = vmatpush3.msra.mxu0 %v6177_v31  ;;  %v6223_v39 = vld [vmem:[%s6509_s5 + $0x160] sm:$0xff]  ;;  %v3327_v45 = vpop.f32.mrf.mxu0 }
 0x225   :  { %4476 = vmatmul.mubr.f32.vlgmr.msra.gmra.mxu1 %v1232_v33  ;;  %3688 = vmatprep.subr.mxu0 %v6184_v32  ;;  %v3328_v18 = vadd.f32 %v3327_v45, %v3326_v38  ;;  %v6315_v33 = vld [vmem:[%s6509_s5 + $0x100] sm:$0xff] }
 0x226   :  { %3689 = vmatpush3.msra.mxu0 %v6191_v34  ;;  %4478 = vmatprep.subr.mxu1 %v4723_v0  ;;  %v3378_v52 = vpop.f32.mrf.mxu0 }
 0x227   :  { %4479 = vmatpush3.msra.mxu1 %v6198_v35  ;;  %4510 = vmatprep.mubr.msk.f32.mxu1 %vm4724_vm0, %v4723_v0  ;;  %v1359_v40 = vadd.f32 %v3328_v18, %v6264_v12 }
 0x228   :  { %4480 = vmatprep.subr.mxu1 %v4723_v0  ;;  %3710 = vmatprep.subr.mxu0 %v5968_v56  ;;  %v3379_v49 = vpop.f32.mrf.mxu0 }
 0x229   :  { %4481 = vmatpush3.msra.mxu1 %v6206_v36  ;;  %v3380_v20 = vadd.f32 %v3379_v49, %v3378_v52  ;;  %v1429_v43 = vadd.f32 %v6125_v13, %v1359_v40  ;;  %v6301_v13 = vld [vmem:[%s6509_s5 + $0x110] sm:$0xff] }
 0x22a   :  { %4482 = vmatprep.subr.mxu1 %v4723_v0 }
 0x22b   :  { %4483 = vmatpush3.msra.mxu1 %v6215_v37  ;;  %v1504_v41 = vadd.f32 %v3380_v20, %v6264_v12  ;;  %v1432_v27 = vmax.f32 %v1429_v43, 0.0 }
 0x22c   :  { %4484 = vmatprep.subr.mxu1 %v4723_v0 }
 0x22d   :  { %4485 = vmatpush3.msra.mxu1 %v6223_v39 }
 0x22e   :  { %4486 = vmatprep.subr.mxu1 %v4723_v0 }
 0x22f   :  { %4487 = vmatpush3.msra.mxu1 %v6230_v44 }
 0x230   :  { %4488 = vmatprep.subr.mxu1 %v4723_v0 }
 0x231   :  { %4489 = vmatpush3.msra.mxu1 %v6237_v47 }
 0x232   :  { %4490 = vmatprep.subr.mxu1 %v4723_v0 }
 0x233   :  { %4491 = vmatpush3.msra.mxu1 %v6244_v46 }
 0x234   :  { %4492 = vmatprep.subr.mxu1 %v4723_v0 }
 0x235   :  { %4493 = vmatpush3.msra.mxu1 %v6251_v48 }
 0x236   :  { %4494 = vmatprep.subr.mxu1 %v4723_v0 }
 0x237   :  { %4495 = vmatpush3.msra.mxu1 %v6258_v55 }
 0x238   :  { %4496 = vmatprep.subr.mxu1 %v4723_v0 }
 0x239   :  { %4497 = vmatpush3.msra.mxu1 %v6270_v22 }
 0x23a   :  { %4498 = vmatprep.subr.mxu1 %v4723_v0 }
 0x23b   :  { %v1573_v50 = vpop.f32.mrf.mxu1  ;;  %4499 = vmatpush3.msra.mxu1 %v6277_v23 }
 0x23c   :  { %v1574_v51 = vadd.f32 %v1573_v50, %v1504_v41  ;;  %4500 = vmatprep.subr.mxu1 %v4723_v0 }
 0x23d   :  { %v4302_v54 = vpop.f32.mrf.mxu1  ;;  %4501 = vmatpush3.msra.mxu1 %v6286_v42  ;;  %v3430_v38 = vpop.f32.mrf.mxu0 }
 0x23e   :  { %v1577_v25 = vmax.f32 %v1574_v51, 0.0  ;;  %4502 = vmatprep.subr.mxu1 %v4723_v0 }
 0x23f   :  { %4503 = vmatpush3.msra.mxu1 %v6294_v53  ;;  %v3431_v45 = vpop.f32.mrf.mxu0 }
 0x240   :  { %2426 = vmatprep.mubr.f32.mxu0 %v1577_v25  ;;  %4504 = vmatprep.subr.mxu1 %v4723_v0  ;;  %v3432_v52 = vadd.f32 %v3431_v45, %v3430_v38 }
 0x241   :  { %2427 = vmatmul.mubr.f32.vlgmr.msra.gmra.mxu0 %v1432_v27  ;;  %4505 = vmatpush3.msra.mxu1 %v6301_v13 }
 0x242   :  { %4506 = vmatprep.subr.mxu1 %v4723_v0  ;;  %3711 = vmatpush3.msra.mxu0 %v5974_v57  ;;  %v1649_v49 = vadd.f32 %v3432_v52, %v6264_v12 }
 0x243   :  { %4507 = vmatpush3.msra.mxu1 %v6308_v28  ;;  %3712 = vmatprep.subr.mxu0 %v5982_v58 }
 0x244   :  { %4508 = vmatprep.subr.mxu1 %v4723_v0  ;;  %3713 = vmatpush3.msra.mxu0 %v5989_v59 }
 0x245   :  { %4509 = vmatpush3.msra.mxu1 %v6315_v33  ;;  %3714 = vmatprep.subr.mxu0 %v5996_v60 }
 0x246   :  { %3715 = vmatpush3.msra.mxu0 %v6003_v61  ;;  %4513 = vmatprep.subr.mxu1 %v4723_v0 }
 0x247   :  { %3716 = vmatprep.subr.mxu0 %v6010_v62 }
 0x248   :  { %3717 = vmatpush3.msra.mxu0 %v6017_v63 }
 0x249   :  { %3718 = vmatprep.subr.mxu0 %v6024_v1 }
 0x24a   :  { %3719 = vmatpush3.msra.mxu0 %v6031_v2 }
 0x24b   :  { %3720 = vmatprep.subr.mxu0 %v6038_v3 }
 0x24c   :  { %3721 = vmatpush3.msra.mxu0 %v6045_v4 }
 0x24d   :  { %3722 = vmatprep.subr.mxu0 %v6052_v5 }
 0x24e   :  { %3723 = vmatpush3.msra.mxu0 %v6059_v6 }
 0x24f   :  { %3724 = vmatprep.subr.mxu0 %v6066_v8 }
 0x250   :  { %3725 = vmatpush3.msra.mxu0 %v6073_v7 }
 0x251   :  { %3726 = vmatprep.subr.mxu0 %v6080_v10 }
 0x252   :  { %3727 = vmatpush3.msra.mxu0 %v6087_v9 }
 0x253   :  { %3728 = vmatprep.subr.mxu0 %v6094_v15 }
 0x254   :  { %3729 = vmatpush3.msra.mxu0 %v6101_v11 }
 0x255   :  { %3730 = vmatprep.subr.mxu0 %v6108_v17 }
 0x256   :  { %3731 = vmatpush3.msra.mxu0 %v6115_v19 }
 0x257   :  { %3732 = vmatprep.subr.mxu0 %v6122_v21 }
 0x258   :  { %3733 = vmatpush3.msra.mxu0 %v6131_v24 }
 0x259   :  { %3734 = vmatprep.subr.mxu0 %v6138_v14 }
 0x25a   :  { %3735 = vmatpush3.msra.mxu0 %v6145_v16 }
 0x25b   :  { %3736 = vmatprep.subr.mxu0 %v6152_v26 }
 0x25c   :  { %3737 = vmatpush3.msra.mxu0 %v6163_v29 }
 0x25d   :  { %v1718_v18 = vpop.f32.mrf.mxu1  ;;  %3738 = vmatprep.subr.mxu0 %v6170_v30 }
 0x25e   :  { %v1719_v20 = vadd.f32 %v1718_v18, %v1649_v49  ;;  %3739 = vmatpush3.msra.mxu0 %v6177_v31  ;;  %v2815_v18 = vld [vmem:[#allocation5 + $0x90] sm:$0xff] }
 0x25f   :  { %v4337_v40 = vpop.f32.mrf.mxu1  ;;  %3740 = vmatprep.subr.mxu0 %v6184_v32 }
 0x260   :  { %v1722_v41 = vmax.f32 %v1719_v20, 0.0  ;;  %3741 = vmatpush3.msra.mxu0 %v6191_v34  ;;  %v2799_v20 = vld [vmem:[#allocation5 + $0x10] sm:$0xff]  ;;  %v2814_v40 = vld [vmem:[#allocation5 + $0x88] sm:$0xff] }
 0x261   :  { %3762 = vmatprep.subr.mxu0 %v5968_v56  ;;  %v3482_v56 = vpop.f32.mrf.mxu0 }
 0x262   :  { %4511 = vmatmul.mubr.f32.vlgmr.msra.gmra.mxu1 %v1722_v41 }
 0x263   :  { %4514 = vmatpush3.msra.mxu1 %v6198_v35  ;;  %4545 = vmatprep.mubr.msk.f32.mxu1 %vm4724_vm0, %v4723_v0  ;;  %v3483_v43 = vpop.f32.mrf.mxu0 }
 0x264   :  { %4515 = vmatprep.subr.mxu1 %v4723_v0  ;;  %v3484_v50 = vadd.f32 %v3483_v43, %v3482_v56  ;;  %v2813_v56 = vld [vmem:[#allocation5 + $0x80] sm:$0xff] }
 0x265   :  { %4516 = vmatpush3.msra.mxu1 %v6206_v36  ;;  %v2797_v43 = vld [vmem:[#allocation5] sm:$0xff] }
 0x266   :  { %4517 = vmatprep.subr.mxu1 %v4723_v0  ;;  %v1794_v51 = vadd.f32 %v3484_v50, %v6264_v12  ;;  %v2843_v50 = vld [vmem:[#allocation5 + $0x170] sm:$0xff] }
 0x267   :  { %4518 = vmatpush3.msra.mxu1 %v6215_v37 }
 0x268   :  { %4519 = vmatprep.subr.mxu1 %v4723_v0 }
 0x269   :  { %4520 = vmatpush3.msra.mxu1 %v6223_v39 }
 0x26a   :  { %4521 = vmatprep.subr.mxu1 %v4723_v0 }
 0x26b   :  { %4522 = vmatpush3.msra.mxu1 %v6230_v44 }
 0x26c   :  { %4523 = vmatprep.subr.mxu1 %v4723_v0 }
 0x26d   :  { %4524 = vmatpush3.msra.mxu1 %v6237_v47 }
 0x26e   :  { %4525 = vmatprep.subr.mxu1 %v4723_v0 }
 0x26f   :  { %4526 = vmatpush3.msra.mxu1 %v6244_v46 }
 0x270   :  { %4527 = vmatprep.subr.mxu1 %v4723_v0 }
 0x271   :  { %4528 = vmatpush3.msra.mxu1 %v6251_v48 }
 0x272   :  { %4529 = vmatprep.subr.mxu1 %v4723_v0 }
 0x273   :  { %4530 = vmatpush3.msra.mxu1 %v6258_v55 }
 0x274   :  { %4531 = vmatprep.subr.mxu1 %v4723_v0 }
 0x275   :  { %4532 = vmatpush3.msra.mxu1 %v6270_v22 }
 0x276   :  { %4533 = vmatprep.subr.mxu1 %v4723_v0 }
 0x277   :  { %4534 = vmatpush3.msra.mxu1 %v6277_v23 }
 0x278   :  { %4535 = vmatprep.subr.mxu1 %v4723_v0 }
 0x279   :  { %4536 = vmatpush3.msra.mxu1 %v6286_v42 }
 0x27a   :  { %4537 = vmatprep.subr.mxu1 %v4723_v0 }
 0x27b   :  { %4538 = vmatpush3.msra.mxu1 %v6294_v53 }
 0x27c   :  { %4539 = vmatprep.subr.mxu1 %v4723_v0 }
 0x27d   :  { %4540 = vmatpush3.msra.mxu1 %v6301_v13 }
 0x27e   :  { %4541 = vmatprep.subr.mxu1 %v4723_v0 }
 0x27f   :  { %v1863_v54 = vpop.f32.mrf.mxu1  ;;  %4542 = vmatpush3.msra.mxu1 %v6308_v28 }
 0x280   :  { %v1864_v25 = vadd.f32 %v1863_v54, %v1794_v51  ;;  %4543 = vmatprep.subr.mxu1 %v4723_v0  ;;  %v2842_v51 = vld [vmem:[#allocation5 + $0x168] sm:$0xff]  ;;  %v2841_v54 = vld [vmem:[#allocation5 + $0x160] sm:$0xff] }
 0x281   :  { %v4372_v27 = vpop.f32.mrf.mxu1  ;;  %4544 = vmatpush3.msra.mxu1 %v6315_v33 }
 0x282   :  { %v1867_v38 = vmax.f32 %v1864_v25, 0.0  ;;  %4548 = vmatprep.subr.mxu1 %v4723_v0  ;;  %v2840_v25 = vld [vmem:[#allocation5 + $0x158] sm:$0xff]  ;;  %v2839_v27 = vld [vmem:[#allocation5 + $0x150] sm:$0xff] }
 0x284   :  { %2571 = vmatprep.mubr.f32.mxu0 %v1867_v38  ;;  %v2838_v38 = vld [vmem:[#allocation5 + $0x148] sm:$0xff] }
 0x285   :  { %2572 = vmatmul.mubr.f32.vlgmr.msra.gmra.mxu0 %v1722_v41  ;;  %v2798_v41 = vld [vmem:[#allocation5 + $0x8] sm:$0xff] }
 0x286   :  { %3763 = vmatpush3.msra.mxu0 %v5974_v57  ;;  %v3534_v57 = vpop.f32.mrf.mxu0 }
 0x287   :  { %3764 = vmatprep.subr.mxu0 %v5982_v58 }
 0x288   :  { %3765 = vmatpush3.msra.mxu0 %v5989_v59  ;;  %v3535_v58 = vpop.f32.mrf.mxu0 }
 0x289   :  { %3766 = vmatprep.subr.mxu0 %v5996_v60  ;;  %v3536_v59 = vadd.f32 %v3535_v58, %v3534_v57  ;;  %v2837_v57 = vld [vmem:[#allocation5 + $0x140] sm:$0xff]  ;;  %v2836_v58 = vld [vmem:[#allocation5 + $0x138] sm:$0xff] }
 0x28a   :  { %3767 = vmatpush3.msra.mxu0 %v6003_v61 }
 0x28b   :  { %3768 = vmatprep.subr.mxu0 %v6010_v62  ;;  %v1939_v60 = vadd.f32 %v3536_v59, %v6264_v12  ;;  %v2835_v59 = vld [vmem:[#allocation5 + $0x130] sm:$0xff] }
 0x28c   :  { %3769 = vmatpush3.msra.mxu0 %v6017_v63 }
 0x28d   :  { %3770 = vmatprep.subr.mxu0 %v6024_v1 }
 0x28e   :  { %3771 = vmatpush3.msra.mxu0 %v6031_v2 }
 0x28f   :  { %3772 = vmatprep.subr.mxu0 %v6038_v3 }
 0x290   :  { %3773 = vmatpush3.msra.mxu0 %v6045_v4 }
 0x291   :  { %3774 = vmatprep.subr.mxu0 %v6052_v5 }
 0x292   :  { %3775 = vmatpush3.msra.mxu0 %v6059_v6 }
 0x293   :  { %3776 = vmatprep.subr.mxu0 %v6066_v8 }
 0x294   :  { %3777 = vmatpush3.msra.mxu0 %v6073_v7 }
 0x295   :  { %3778 = vmatprep.subr.mxu0 %v6080_v10 }
 0x296   :  { %3779 = vmatpush3.msra.mxu0 %v6087_v9  ;;  %v2828_v9 = vld [vmem:[#allocation5 + $0xf8] sm:$0xff] }
 0x297   :  { %3780 = vmatprep.subr.mxu0 %v6094_v15  ;;  %v2812_v15 = vld [vmem:[#allocation5 + $0x78] sm:$0xff] }
 0x298   :  { %3781 = vmatpush3.msra.mxu0 %v6101_v11  ;;  %v2827_v11 = vld [vmem:[#allocation5 + $0xf0] sm:$0xff] }
 0x299   :  { %3782 = vmatprep.subr.mxu0 %v6108_v17  ;;  %v2811_v17 = vld [vmem:[#allocation5 + $0x70] sm:$0xff] }
 0x29a   :  { %3783 = vmatpush3.msra.mxu0 %v6115_v19  ;;  %v2826_v19 = vld [vmem:[#allocation5 + $0xe8] sm:$0xff] }
 0x29b   :  { %3784 = vmatprep.subr.mxu0 %v6122_v21  ;;  %v2810_v21 = vld [vmem:[#allocation5 + $0x68] sm:$0xff] }
 0x29c   :  { %3785 = vmatpush3.msra.mxu0 %v6131_v24  ;;  %v2825_v24 = vld [vmem:[#allocation5 + $0xe0] sm:$0xff] }
 0x29d   :  { %3786 = vmatprep.subr.mxu0 %v6138_v14  ;;  %v2809_v14 = vld [vmem:[#allocation5 + $0x60] sm:$0xff] }
 0x29e   :  { %3787 = vmatpush3.msra.mxu0 %v6145_v16  ;;  %v2824_v16 = vld [vmem:[#allocation5 + $0xd8] sm:$0xff] }
 0x29f   :  { %3788 = vmatprep.subr.mxu0 %v6152_v26  ;;  %v2808_v26 = vld [vmem:[#allocation5 + $0x58] sm:$0xff] }
 0x2a0   :  { %3789 = vmatpush3.msra.mxu0 %v6163_v29  ;;  %v2823_v29 = vld [vmem:[#allocation5 + $0xd0] sm:$0xff] }
 0x2a1   :  { %v2008_v61 = vpop.f32.mrf.mxu1  ;;  %3790 = vmatprep.subr.mxu0 %v6170_v30  ;;  %v2807_v30 = vld [vmem:[#allocation5 + $0x50] sm:$0xff] }
 0x2a2   :  { %v2009_v62 = vadd.f32 %v2008_v61, %v1939_v60  ;;  %3791 = vmatpush3.msra.mxu0 %v6177_v31  ;;  %v2822_v31 = vld [vmem:[#allocation5 + $0xc8] sm:$0xff]  ;;  %v2833_v61 = vld [vmem:[#allocation5 + $0x120] sm:$0xff] }
 0x2a3   :  { %v4407_v63 = vpop.f32.mrf.mxu1  ;;  %3792 = vmatprep.subr.mxu0 %v6184_v32  ;;  %v3586_v2 = vpop.f32.mrf.mxu0  ;;  %v2806_v32 = vld [vmem:[#allocation5 + $0x48] sm:$0xff] }
 0x2a4   :  { %v2012_v1 = vmax.f32 %v2009_v62, 0.0  ;;  %3793 = vmatpush3.msra.mxu0 %v6191_v34  ;;  %v2821_v34 = vld [vmem:[#allocation5 + $0xc0] sm:$0xff]  ;;  %v2834_v60 = vld [vmem:[#allocation5 + $0x128] sm:$0xff]  ;;  %v2832_v63 = vld [vmem:[#allocation5 + $0x118] sm:$0xff] }
 0x2a5   :  { %v3587_v3 = vpop.f32.mrf.mxu0  ;;  %3814 = vmatprep.subr.mxu0 %v2828_v9  ;;  %v3123_v9 = vld [vmem:[%s6510_s6] ss:$0 sm:$0xff] }
 0x2a6   :  { %4546 = vmatmul.mubr.f32.vlgmr.msra.gmra.mxu1 %v2012_v1  ;;  %v3588_v4 = vadd.f32 %v3587_v3, %v3586_v2  ;;  %v2831_v2 = vld [vmem:[#allocation5 + $0x110] sm:$0xff]  ;;  %v2830_v3 = vld [vmem:[#allocation5 + $0x108] sm:$0xff] }
 0x2a7   :  { %4549 = vmatpush3.msra.mxu1 %v6198_v35  ;;  %4580 = vmatprep.mubr.msk.f32.mxu1 %vm4724_vm0, %v4723_v0  ;;  %v2805_v35 = vld [vmem:[#allocation5 + $0x40] sm:$0xff] }
 0x2a8   :  { %4550 = vmatprep.subr.mxu1 %v4723_v0  ;;  %v2084_v5 = vadd.f32 %v3588_v4, %v6264_v12  ;;  %v2829_v4 = vld [vmem:[#allocation5 + $0x100] sm:$0xff] }
 0x2a9   :  { %4551 = vmatpush3.msra.mxu1 %v6206_v36  ;;  %v2820_v36 = vld [vmem:[#allocation5 + $0xb8] sm:$0xff] }
 0x2aa   :  { %4552 = vmatprep.subr.mxu1 %v4723_v0 }
 0x2ab   :  { %4553 = vmatpush3.msra.mxu1 %v6215_v37  ;;  %v2804_v37 = vld [vmem:[#allocation5 + $0x38] sm:$0xff] }
 0x2ac   :  { %4554 = vmatprep.subr.mxu1 %v4723_v0 }
 0x2ad   :  { %4555 = vmatpush3.msra.mxu1 %v6223_v39  ;;  %v2819_v39 = vld [vmem:[#allocation5 + $0xb0] sm:$0xff] }
 0x2ae   :  { %4556 = vmatprep.subr.mxu1 %v4723_v0 }
 0x2af   :  { %4557 = vmatpush3.msra.mxu1 %v6230_v44 }
 0x2b0   :  { %4558 = vmatprep.subr.mxu1 %v4723_v0 }
 0x2b1   :  { %4559 = vmatpush3.msra.mxu1 %v6237_v47  ;;  %v2803_v47 = vld [vmem:[#allocation5 + $0x30] sm:$0xff] }
 0x2b2   :  { %4560 = vmatprep.subr.mxu1 %v4723_v0 }
 0x2b3   :  { %4561 = vmatpush3.msra.mxu1 %v6244_v46  ;;  %v2818_v46 = vld [vmem:[#allocation5 + $0xa8] sm:$0xff] }
 0x2b4   :  { %4562 = vmatprep.subr.mxu1 %v4723_v0 }
 0x2b5   :  { %4563 = vmatpush3.msra.mxu1 %v6251_v48  ;;  %v2802_v48 = vld [vmem:[#allocation5 + $0x28] sm:$0xff] }
 0x2b6   :  { %4564 = vmatprep.subr.mxu1 %v4723_v0 }
 0x2b7   :  { %4565 = vmatpush3.msra.mxu1 %v6258_v55  ;;  %v2817_v55 = vld [vmem:[#allocation5 + $0xa0] sm:$0xff] }
 0x2b8   :  { %4566 = vmatprep.subr.mxu1 %v4723_v0 }
 0x2b9   :  { %4567 = vmatpush3.msra.mxu1 %v6270_v22 }
 0x2ba   :  { %4568 = vmatprep.subr.mxu1 %v4723_v0 }
 0x2bb   :  { %4569 = vmatpush3.msra.mxu1 %v6277_v23  ;;  %v2801_v23 = vld [vmem:[#allocation5 + $0x20] sm:$0xff] }
 0x2bc   :  { %4570 = vmatprep.subr.mxu1 %v4723_v0 }
 0x2bd   :  { %4571 = vmatpush3.msra.mxu1 %v6286_v42  ;;  %v2816_v42 = vld [vmem:[#allocation5 + $0x98] sm:$0xff] }
 0x2be   :  { %4572 = vmatprep.subr.mxu1 %v4723_v0 }
 0x2bf   :  { %4573 = vmatpush3.msra.mxu1 %v6294_v53  ;;  %v2800_v53 = vld [vmem:[#allocation5 + $0x18] sm:$0xff] }
 0x2c0   :  { %4574 = vmatprep.subr.mxu1 %v4723_v0 }
 0x2c1   :  { %4575 = vmatpush3.msra.mxu1 %v6301_v13 }
 0x2c2   :  { %4576 = vmatprep.subr.mxu1 %v4723_v0 }
 0x2c3   :  { %v2153_v6 = vpop.f32.mrf.mxu1  ;;  %4577 = vmatpush3.msra.mxu1 %v6308_v28 }
 0x2c4   :  { %v2154_v8 = vadd.f32 %v2153_v6, %v2084_v5  ;;  %4578 = vmatprep.subr.mxu1 %v4723_v0 }
 0x2c5   :  { %v4442_v7 = vpop.f32.mrf.mxu1  ;;  %4579 = vmatpush3.msra.mxu1 %v6315_v33  ;;  %v3638_v44 = vpop.f32.mrf.mxu0 }
 0x2c6   :  { %v2157_v10 = vmax.f32 %v2154_v8, 0.0  ;;  %4583 = vmatprep.subr.mxu1 %v4723_v0 }
 0x2c7   :  { %v3639_v22 = vpop.f32.mrf.mxu0 }
 0x2c8   :  { %2716 = vmatprep.mubr.f32.mxu0 %v2157_v10  ;;  %v3640_v13 = vadd.f32 %v3639_v22, %v3638_v44  ;;  %v3007_v44 = vld [vmem:[#allocation7 + $0x70] sm:$0xff]  ;;  %v3002_v22 = vld [vmem:[#allocation7 + $0x48] sm:$0xff] }
 0x2c9   :  { %2717 = vmatmul.mubr.f32.vlgmr.msra.gmra.mxu0 %v2012_v1 }
 0x2ca   :  { %3815 = vmatpush3.msra.mxu0 %v2812_v15  ;;  %v2229_v28 = vadd.f32 %v3640_v13, %v6264_v12  ;;  %v2844_v12 = vld [vmem:[#allocation5 + $0x178] sm:$0xff]  ;;  %v2998_v13 = vld [vmem:[#allocation7 + $0x28] sm:$0xff] }
 0x2cb   :  { %3816 = vmatprep.subr.mxu0 %v2827_v11 }
 0x2cc   :  { %3817 = vmatpush3.msra.mxu0 %v2811_v17 }
 0x2cd   :  { %3818 = vmatprep.subr.mxu0 %v2826_v19 }
 0x2ce   :  { %3819 = vmatpush3.msra.mxu0 %v2810_v21 }
 0x2cf   :  { %3820 = vmatprep.subr.mxu0 %v2825_v24 }
 0x2d0   :  { %3821 = vmatpush3.msra.mxu0 %v2809_v14 }
 0x2d1   :  { %3822 = vmatprep.subr.mxu0 %v2824_v16 }
 0x2d2   :  { %3823 = vmatpush3.msra.mxu0 %v2808_v26 }
 0x2d3   :  { %3824 = vmatprep.subr.mxu0 %v2823_v29 }
 0x2d4   :  { %3825 = vmatpush3.msra.mxu0 %v2807_v30 }
 0x2d5   :  { %3826 = vmatprep.subr.mxu0 %v2822_v31 }
 0x2d6   :  { %3827 = vmatpush3.msra.mxu0 %v2806_v32 }
 0x2d7   :  { %3828 = vmatprep.subr.mxu0 %v2821_v34 }
 0x2d8   :  { %3829 = vmatpush3.msra.mxu0 %v2805_v35 }
 0x2d9   :  { %3830 = vmatprep.subr.mxu0 %v2820_v36 }
 0x2da   :  { %3831 = vmatpush3.msra.mxu0 %v2804_v37 }
 0x2db   :  { %3832 = vmatprep.subr.mxu0 %v2819_v39  ;;  %v3008_v39 = vld [vmem:[#allocation7 + $0x78] sm:$0xff] }
 0x2dc   :  { %3833 = vmatpush3.msra.mxu0 %v2803_v47  ;;  %v3006_v47 = vld [vmem:[#allocation7 + $0x68] sm:$0xff] }
 0x2dd   :  { %3834 = vmatprep.subr.mxu0 %v2818_v46  ;;  %v3005_v46 = vld [vmem:[#allocation7 + $0x60] sm:$0xff] }
 0x2de   :  { %3835 = vmatpush3.msra.mxu0 %v2802_v48  ;;  %v3004_v48 = vld [vmem:[#allocation7 + $0x58] sm:$0xff] }
 0x2df   :  { %3836 = vmatprep.subr.mxu0 %v2817_v55  ;;  %v3003_v55 = vld [vmem:[#allocation7 + $0x50] sm:$0xff] }
 0x2e0   :  { %3837 = vmatpush3.msra.mxu0 %v2801_v23  ;;  %v3001_v23 = vld [vmem:[#allocation7 + $0x40] sm:$0xff] }
 0x2e1   :  { %3838 = vmatprep.subr.mxu0 %v2816_v42  ;;  %v3000_v42 = vld [vmem:[#allocation7 + $0x38] sm:$0xff] }
 0x2e2   :  { %3839 = vmatpush3.msra.mxu0 %v2800_v53  ;;  %v2999_v53 = vld [vmem:[#allocation7 + $0x30] sm:$0xff] }
 0x2e3   :  { %3840 = vmatprep.subr.mxu0 %v2815_v18 }
 0x2e4   :  { %3841 = vmatpush3.msra.mxu0 %v2799_v20 }
 0x2e5   :  { %v2298_v33 = vpop.f32.mrf.mxu1  ;;  %3842 = vmatprep.subr.mxu0 %v2814_v40 }
 0x2e6   :  { %v2299_v45 = vadd.f32 %v2298_v33, %v2229_v28  ;;  %3843 = vmatpush3.msra.mxu0 %v2798_v41  ;;  %v2997_v28 = vld [vmem:[#allocation7 + $0x20] sm:$0xff]  ;;  %v2996_v33 = vld [vmem:[#allocation7 + $0x18] sm:$0xff] }
 0x2e7   :  { %v4477_v52 = vpop.f32.mrf.mxu1  ;;  %3844 = vmatprep.subr.mxu0 %v2813_v56  ;;  %v3124_v41 = vld [vmem:[%s6512_s8] ss:$0 sm:$0xff] }
 0x2e8   :  { %v2302_v49 = vmax.f32 %v2299_v45, 0.0  ;;  %3845 = vmatpush3.msra.mxu0 %v2797_v43  ;;  %v2995_v45 = vld [vmem:[#allocation7 + $0x10] sm:$0xff]  ;;  %v2994_v52 = vld [vmem:[#allocation7 + $0x8] sm:$0xff] }
 0x2e9   :  { %4618 = vmatprep.subr.mxu0 %v4723_v0 }
 0x2ea   :  { %4581 = vmatmul.mubr.f32.vlgmr.msra.gmra.mxu1 %v2302_v49  ;;  %v2993_v49 = vld [vmem:[#allocation7] sm:$0xff] }
 0x2eb   :  { %4615 = vmatprep.mubr.msk.f32.mxu1 %vm4724_vm0, %v4723_v0  ;;  %4584 = vmatpush3.msra.mxu1 %v2844_v12 }
 0x2ec   :  { %4585 = vmatprep.subr.mxu1 %v4723_v0 }
 0x2ed   :  { %4586 = vmatpush3.msra.mxu1 %v2843_v50 }
 0x2ee   :  { %4587 = vmatprep.subr.mxu1 %v4723_v0 }
 0x2ef   :  { %4588 = vmatpush3.msra.mxu1 %v2842_v51 }
 0x2f0   :  { %4589 = vmatprep.subr.mxu1 %v4723_v0 }
 0x2f1   :  { %4590 = vmatpush3.msra.mxu1 %v2841_v54  ;;  %v3125_v54 = vld [vmem:[%s6514_s10] ss:$0 sm:$0xff] }
 0x2f2   :  { %4591 = vmatprep.subr.mxu1 %v4723_v0 }
 0x2f3   :  { %4592 = vmatpush3.msra.mxu1 %v2840_v25 }
 0x2f4   :  { %4593 = vmatprep.subr.mxu1 %v4723_v0 }
 0x2f5   :  { %4594 = vmatpush3.msra.mxu1 %v2839_v27 }
 0x2f6   :  { %4595 = vmatprep.subr.mxu1 %v4723_v0 }
 0x2f7   :  { %4596 = vmatpush3.msra.mxu1 %v2838_v38 }
 0x2f8   :  { %4597 = vmatprep.subr.mxu1 %v4723_v0 }
 0x2f9   :  { %4598 = vmatpush3.msra.mxu1 %v2837_v57 }
 0x2fa   :  { %4599 = vmatprep.subr.mxu1 %v4723_v0 }
 0x2fb   :  { %4600 = vmatpush3.msra.mxu1 %v2836_v58 }
 0x2fc   :  { %4601 = vmatprep.subr.mxu1 %v4723_v0 }
 0x2fd   :  { %4602 = vmatpush3.msra.mxu1 %v2835_v59 }
 0x2fe   :  { %4603 = vmatprep.subr.mxu1 %v4723_v0 }
 0x2ff   :  { %4604 = vmatpush3.msra.mxu1 %v2834_v60 }
 0x300   :  { %4605 = vmatprep.subr.mxu1 %v4723_v0 }
 0x301   :  { %4606 = vmatpush3.msra.mxu1 %v2833_v61  ;;  %v3690_v5 = vpop.f32.mrf.mxu0 }
 0x302   :  { %4607 = vmatprep.subr.mxu1 %v4723_v0 }
 0x303   :  { %4608 = vmatpush3.msra.mxu1 %v2832_v63  ;;  %v3691_v6 = vpop.f32.mrf.mxu0 }
 0x304   :  { %4609 = vmatprep.subr.mxu1 %v4723_v0  ;;  %v3692_v10 = vadd.f32 %v3691_v6, %v3690_v5 }
 0x305   :  { %4610 = vmatpush3.msra.mxu1 %v2831_v2 }
 0x306   :  { %4611 = vmatprep.subr.mxu1 %v4723_v0  ;;  %v2429_v11 = vadd.f32 %v3692_v10, %v3123_v9 }
 0x307   :  { %4612 = vmatpush3.msra.mxu1 %v2830_v3 }
 0x308   :  { %4613 = vmatprep.subr.mxu1 %v4723_v0 }
 0x309   :  { %4614 = vmatpush3.msra.mxu1 %v2829_v4 }
 0x322   :  { %v2498_v62 = vpop.f32.mrf.mxu1 }
 0x323   :  { %v2499_v19 = vadd.f32 %v2498_v62, %v2429_v11 }
 0x324   :  { %v4512_v1 = vpop.f32.mrf.mxu1 }
 0x325   :  { %v2502_v26 = vmax.f32 %v2499_v19, 0.0 }
 0x345   :  { %v3742_v8 = vpop.f32.mrf.mxu0 }
 0x347   :  { %v3743_v7 = vpop.f32.mrf.mxu0 }
 0x348   :  { %v3744_v15 = vadd.f32 %v3743_v7, %v3742_v8 }
 0x34a   :  { %v2574_v17 = vadd.f32 %v3744_v15, %v3123_v9 }
 0x366   :  { %v2643_v21 = vpop.f32.mrf.mxu1 }
 0x367   :  { %v2644_v24 = vadd.f32 %v2643_v21, %v2574_v17 }
 0x368   :  { %v4547_v14 = vpop.f32.mrf.mxu1 }
 0x369   :  { %v2647_v16 = vmax.f32 %v2644_v24, 0.0 }
 0x36b   :  { %2916 = vmatprep.mubr.f32.mxu0 %v2647_v16 }
 0x36c   :  { %2917 = vmatmul.mubr.f32.vlgmr.msra.gmra.mxu0 %v2502_v26 }
 0x36d   :  { %4650 = vmatprep.mubr.msk.f32.mxu0 %vm4724_vm0, %v4723_v0  ;;  %4619 = vmatpush3.msra.mxu0 %v3008_v39 }
 0x36e   :  { %4620 = vmatprep.subr.mxu0 %v4723_v0 }
 0x36f   :  { %4621 = vmatpush3.msra.mxu0 %v3007_v44 }
 0x370   :  { %4622 = vmatprep.subr.mxu0 %v4723_v0 }
 0x371   :  { %4623 = vmatpush3.msra.mxu0 %v3006_v47 }
 0x372   :  { %4624 = vmatprep.subr.mxu0 %v4723_v0 }
 0x373   :  { %4625 = vmatpush3.msra.mxu0 %v3005_v46 }
 0x374   :  { %4626 = vmatprep.subr.mxu0 %v4723_v0 }
 0x375   :  { %4627 = vmatpush3.msra.mxu0 %v3004_v48 }
 0x376   :  { %4628 = vmatprep.subr.mxu0 %v4723_v0 }
 0x377   :  { %4629 = vmatpush3.msra.mxu0 %v3003_v55 }
 0x378   :  { %4630 = vmatprep.subr.mxu0 %v4723_v0 }
 0x379   :  { %4631 = vmatpush3.msra.mxu0 %v3002_v22 }
 0x37a   :  { %4632 = vmatprep.subr.mxu0 %v4723_v0 }
 0x37b   :  { %4633 = vmatpush3.msra.mxu0 %v3001_v23 }
 0x37c   :  { %4634 = vmatprep.subr.mxu0 %v4723_v0 }
 0x37d   :  { %4635 = vmatpush3.msra.mxu0 %v3000_v42 }
 0x37e   :  { %4636 = vmatprep.subr.mxu0 %v4723_v0 }
 0x37f   :  { %4637 = vmatpush3.msra.mxu0 %v2999_v53 }
 0x380   :  { %4638 = vmatprep.subr.mxu0 %v4723_v0 }
 0x381   :  { %4639 = vmatpush3.msra.mxu0 %v2998_v13 }
 0x382   :  { %4640 = vmatprep.subr.mxu0 %v4723_v0 }
 0x383   :  { %4641 = vmatpush3.msra.mxu0 %v2997_v28 }
 0x384   :  { %4642 = vmatprep.subr.mxu0 %v4723_v0 }
 0x385   :  { %4643 = vmatpush3.msra.mxu0 %v2996_v33 }
 0x386   :  { %4644 = vmatprep.subr.mxu0 %v4723_v0 }
 0x387   :  { %4645 = vmatpush3.msra.mxu0 %v2995_v45 }
 0x388   :  { %4646 = vmatprep.subr.mxu0 %v4723_v0 }
 0x389   :  { %v3794_v29 = vpop.f32.mrf.mxu0  ;;  %4647 = vmatpush3.msra.mxu0 %v2994_v52 }
 0x38a   :  { %4648 = vmatprep.subr.mxu0 %v4723_v0 }
 0x38b   :  { %v3795_v30 = vpop.f32.mrf.mxu0  ;;  %4649 = vmatpush3.msra.mxu0 %v2993_v49 }
 0x38c   :  { %v3796_v31 = vadd.f32 %v3795_v30, %v3794_v29 }
 0x38e   :  { %v2719_v32 = vadd.f32 %v3796_v31, %v3123_v9 }
 0x3aa   :  { %v2788_v34 = vpop.f32.mrf.mxu1 }
 0x3ab   :  { %v2789_v35 = vadd.f32 %v2788_v34, %v2719_v32 }
 0x3ac   :  { %v4582_v36 = vpop.f32.mrf.mxu1 }
 0x3ad   :  { %v2792_v37 = vmax.f32 %v2789_v35, 0.0 }
 0x3af   :  { %4616 = vmatmul.mubr.f32.vlgmr.msra.gmra.mxu1 %v2792_v37 }
 0x42c   :  { %v3846_v18 = vpop.f32.mrf.mxu0 }
 0x42e   :  { %v3847_v20 = vpop.f32.mrf.mxu0 }
 0x42f   :  { %v3848_v40 = vadd.f32 %v3847_v20, %v3846_v18 }
 0x431   :  { %v2919_v56 = vadd.f32 %v3848_v40, %v3124_v41 }
 0x46f   :  { %v2988_v43 = vpop.f32.mrf.mxu1 }
 0x470   :  { %v2989_v12 = vadd.f32 %v2988_v43, %v2919_v56 }
 0x471   :  { %v4617_v50 = vpop.f32.mrf.mxu1 }
 0x472   :  { %v2992_v51 = vmax.f32 %v2989_v12, 0.0 }
 0x474   :  { %4651 = vmatmul.mubr.f32.vlgmr.msra.gmra.mxu0 %v2992_v51 }
 0x534   :  { %v3082_v0 = vpop.f32.mrf.mxu0 }
 0x535   :  { %v3083_v25 = vadd.f32 %v3125_v54, %v3082_v0 }
 0x536   :  { %v4652_v27 = vpop.f32.mrf.mxu0 }
 0x537   :  { %3086 = vst [vmem:[%s6515_s11] sm:$0xff] %v3083_v25 }
 0x538   :  { %3091 = vsyncpa [#allocation6], 1 }
 0x539   :  { %3092 = vsyncpa [#allocation8], 1 }

</bundles_post_ra>
